<compile_context>
chip_gen: v5e
topology: v5e:2x2
jax: 0.10.0
libtpu: 0.0.40
codegen_flags: <defaults>
</compile_context>

<pallas_src>
import functools

import jax
import jax.numpy as jnp
from jax import lax
from jax.experimental import pallas as pl
from jax.experimental.pallas import tpu as pltpu


# ---------------------------------------------------------------------------
# Stage 1: hoisted input projection  gates_x = x @ Wx + b  (one big matmul)
# ---------------------------------------------------------------------------
def _input_proj_kernel(x_ref, wx_ref, b_ref, gx_ref):
    gx_ref[...] = (
        jnp.dot(x_ref[...], wx_ref[...], preferred_element_type=jnp.float32)
        + b_ref[...]
    ).astype(gx_ref.dtype)


# ---------------------------------------------------------------------------
# Stage 2: the recurrence.  One grid step == one chunk of `time_steps` steps.
# Hidden / cell state live in VMEM scratch and persist across the sequential
# grid axis.
# ---------------------------------------------------------------------------
def _lstm_recurrence_kernel(gx_ref, wh_ref, out_ref, h_last_ref, c_last_ref,
                            h_sc, c_sc, *, hidden_size, time_steps):
    H = hidden_size
    chunk = pl.program_id(0)

    @pl.when(chunk == 0)
    def _():
        h_sc[...] = jnp.zeros_like(h_sc)
        c_sc[...] = jnp.zeros_like(c_sc)

    # Hoist the (constant) recurrent weight load out of the time loop.
    wh = wh_ref[...]

    def step(s, carry):
        del carry
        gx_t = gx_ref[s]                          # (B, 4H) precomputed x-part
        h_prev = h_sc[...]                        # (B, H)
        # Only one small MXU matmul remains on the serial critical path.
        gates = gx_t + jnp.dot(h_prev, wh, preferred_element_type=jnp.float32)

        cand = jnp.tanh(gates[:, 0:H])            # candidate cell state
        sig = jax.nn.sigmoid(gates[:, H:])        # one wide sigmoid over 3H
        fg = sig[:, 0:H]                          # forget gate
        ig = sig[:, H:2 * H]                      # input gate
        og = sig[:, 2 * H:3 * H]                  # output gate

        c_new = fg * c_sc[...] + ig * cand
        h_new = og * jnp.tanh(c_new)

        h_sc[...] = h_new
        c_sc[...] = c_new
        out_ref[s] = h_new.astype(out_ref.dtype)  # (B, H) slab of this chunk
        return 0

    lax.fori_loop(0, time_steps, step, 0, unroll=True)

    # Last-state outputs map to the same block every grid step; only write
    # them on the final chunk (saves the per-step vector-store slot).
    @pl.when(chunk == pl.num_programs(0) - 1)
    def _():
        h_last_ref[...] = h_sc[...].astype(h_last_ref.dtype)
        c_last_ref[...] = c_sc[...].astype(c_last_ref.dtype)


def _pick_tile(n, candidates):
    """Largest candidate that divides n; falls back to n (one full block)."""
    for c in candidates:
        if c <= n and n % c == 0:
            return c
    return n


def lstm_forward(x, wx, wh, b):
    """Pallas LSTM forward.

    Args:
      x : (B, T, I) float32
      wx: (I, 4H)   float32
      wh: (H, 4H)   float32
      b : (1, 4H)   float32

    Returns:
      (outputs (B, T, H), (last_hidden (B, H), last_cell (B, H)))
    """
    B, T, I = x.shape
    H = wh.shape[0]
    G = 4 * H
    dtype = x.dtype

    # ---- Stage 1: input projection over the whole sequence -----------------
    # Time-major layout so the recurrence indexes its cheap leading axis and
    # the wrapper only does trivial transposes.
    x_tm = jnp.swapaxes(x, 0, 1).reshape(T * B, I)          # (T*B, I)
    M = T * B
    tm = _pick_tile(M, (1024, 512, 256, 128, 64, 32, 16, 8))

    gates_x = pl.pallas_call(
        _input_proj_kernel,
        out_shape=jax.ShapeDtypeStruct((M, G), jnp.float32),
        grid_spec=pltpu.PrefetchScalarGridSpec(
            num_scalar_prefetch=0,
            grid=(M // tm,),
            in_specs=[
                pl.BlockSpec((tm, I), lambda m: (m, 0)),
                pl.BlockSpec((I, G), lambda m: (0, 0)),
                pl.BlockSpec((1, G), lambda m: (0, 0)),
            ],
            out_specs=pl.BlockSpec((tm, G), lambda m: (m, 0)),
        ),
        compiler_params=pltpu.CompilerParams(
            dimension_semantics=("parallel",),   # independent M tiles
        ),
    )(x_tm, wx, b)
    gates_x = gates_x.reshape(T, B, G)                       # time-major

    # ---- Stage 2: sequential recurrence, chunked over time -----------------
    TS = _pick_tile(T, (16, 8, 4, 2, 1))
    kernel = functools.partial(
        _lstm_recurrence_kernel, hidden_size=H, time_steps=TS)

    out_tm, h_last, c_last = pl.pallas_call(
        kernel,
        out_shape=(
            jax.ShapeDtypeStruct((T, B, H), dtype),
            jax.ShapeDtypeStruct((B, H), dtype),
            jax.ShapeDtypeStruct((B, H), dtype),
        ),
        grid_spec=pltpu.PrefetchScalarGridSpec(
            num_scalar_prefetch=0,
            grid=(T // TS,),
            in_specs=[
                pl.BlockSpec((TS, B, G), lambda c: (c, 0, 0)),
                # Constant index_map: Wh stays resident in VMEM; the pipeline
                # does not re-DMA it.  For production-sized H add
                # pipeline_mode=pl.Buffered(1) so it is not double-buffered.
                pl.BlockSpec((H, G), lambda c: (0, 0)),
            ],
            out_specs=[
                pl.BlockSpec((TS, B, H), lambda c: (c, 0, 0)),
                pl.BlockSpec((B, H), lambda c: (0, 0)),
                pl.BlockSpec((B, H), lambda c: (0, 0)),
            ],
            scratch_shapes=[
                pltpu.VMEM((B, H), jnp.float32),   # hidden state carry
                pltpu.VMEM((B, H), jnp.float32),   # cell state carry
            ],
        ),
        compiler_params=pltpu.CompilerParams(
            dimension_semantics=("arbitrary",),    # true sequential recurrence
        ),
    )(gates_x, wh)

    outputs = jnp.swapaxes(out_tm, 0, 1)           # (B, T, H)
    return outputs, (h_last, c_last)


def lstm_reference(x, wx, wh, b):
    """Pure-JAX reference for correctness checking."""
    B, T, I = x.shape
    H = wh.shape[0]

    def step(carry, x_t):
        h, c = carry
        gates = x_t @ wx + h @ wh + b            # (B, 4H)
        cand = jnp.tanh(gates[:, 0:H])
        fg = jax.nn.sigmoid(gates[:, H:2 * H])
        ig = jax.nn.sigmoid(gates[:, 2 * H:3 * H])
        og = jax.nn.sigmoid(gates[:, 3 * H:4 * H])
        c_new = fg * c + ig * cand
        h_new = og * jnp.tanh(c_new)
        return (h_new, c_new), h_new

    h0 = jnp.zeros((B, H), x.dtype)
    c0 = jnp.zeros((B, H), x.dtype)
    (h_last, c_last), hs = jax.lax.scan(step, (h0, c0), jnp.swapaxes(x, 0, 1))
    return jnp.swapaxes(hs, 0, 1), (h_last, c_last)


if __name__ == "__main__":
    # Small shapes consistent with the module: x is (batch, seq_len, input_size).
    batch, seq_len, input_size, hidden_size = 2, 8, 16, 32

    key = jax.random.PRNGKey(0)
    kx, kw, kb = jax.random.split(key, 3)

    x = jax.random.normal(kx, (batch, seq_len, input_size), dtype=jnp.float32)

    # Deterministic init of the single nn.Linear(I + H, 4H); PyTorch stores the
    # weight as (4H, I+H) — sample in that shape then split / transpose.
    fan_in = input_size + hidden_size
    bound = 1.0 / jnp.sqrt(jnp.float32(fan_in))
    w_full = jax.random.uniform(
        kw, (4 * hidden_size, fan_in), dtype=jnp.float32, minval=-bound, maxval=bound)
    b_full = jax.random.uniform(
        kb, (4 * hidden_size,), dtype=jnp.float32, minval=-bound, maxval=bound)

    wx = jnp.transpose(w_full[:, :input_size])        # (I, 4H)
    wh = jnp.transpose(w_full[:, input_size:])        # (H, 4H)
    b = b_full.reshape(1, 4 * hidden_size)            # (1, 4H)

    fwd = jax.jit(lstm_forward)
    out, (h_last, c_last) = fwd(x, wx, wh, b)
    jax.block_until_ready((out, h_last, c_last))

    ref_out, (ref_h, ref_c) = lstm_reference(x, wx, wh, b)
    assert out.shape == (batch, seq_len, hidden_size)
    assert h_last.shape == (batch, hidden_size)
    assert c_last.shape == (batch, hidden_size)
    assert jnp.allclose(out, ref_out, atol=1e-5, rtol=1e-5)
    assert jnp.allclose(h_last, ref_h, atol=1e-5, rtol=1e-5)
    assert jnp.allclose(c_last, ref_c, atol=1e-5, rtol=1e-5)

    print("KERNEL_OK")
</pallas_src>

<mosaic_0001>
module attributes {stable_mosaic.version = 11 : i64} {
  func.func @_input_proj_kernel(%arg0: i32, %arg1: memref<16x16xf32, #tpu.memory_space<vmem>>, %arg2: memref<16x128xf32, #tpu.memory_space<vmem>>, %arg3: memref<1x128xf32, #tpu.memory_space<vmem>>, %arg4: memref<16x128xf32, #tpu.memory_space<vmem>>) attributes {dimension_semantics = [#tpu.dimension_semantics<parallel>], iteration_bounds = array<i64: 1>, scalar_prefetch = 0 : i64, scratch_operands = 0 : i64, tpu.core_type = #tpu.core_type<tc>, window_params = [{transform_indices = @transform_0, window_bounds = array<i64: 16, 16>}, {pipeline_mode = #tpu.pipeline_mode<synchronous>, transform_indices = @transform_1, window_bounds = array<i64: 16, 128>}, {pipeline_mode = #tpu.pipeline_mode<synchronous>, transform_indices = @transform_2, window_bounds = array<i64: 1, 128>}, {transform_indices = @transform_3, window_bounds = array<i64: 16, 128>}]} {
    %c0 = arith.constant 0 : index
    %c0_0 = arith.constant 0 : index
    %0 = vector.load %arg1[%c0, %c0_0] : memref<16x16xf32, #tpu.memory_space<vmem>>, vector<16x16xf32>
    %c0_1 = arith.constant 0 : index
    %c0_2 = arith.constant 0 : index
    %1 = vector.load %arg2[%c0_1, %c0_2] : memref<16x128xf32, #tpu.memory_space<vmem>>, vector<16x128xf32>
    %cst = arith.constant dense<0.000000e+00> : vector<16x128xf32>
    %2 = tpu.matmul %0, %1, %cst {dimension_numbers = #tpu.dot_dimension_numbers<[1], [0], [0], [1], [0, 0, 1, 1], [], []>} : vector<16x16xf32>, vector<16x128xf32>, vector<16x128xf32> -> vector<16x128xf32>
    %c0_3 = arith.constant 0 : index
    %c0_4 = arith.constant 0 : index
    %3 = vector.load %arg3[%c0_3, %c0_4] : memref<1x128xf32, #tpu.memory_space<vmem>>, vector<1x128xf32>
    %4 = vector.broadcast %3 : vector<1x128xf32> to vector<16x128xf32>
    %5 = arith.addf %2, %4 : vector<16x128xf32>
    %c0_5 = arith.constant 0 : index
    %c0_6 = arith.constant 0 : index
    %6 = vector.load %arg4[%c0_5, %c0_6] : memref<16x128xf32, #tpu.memory_space<vmem>>, vector<16x128xf32>
    tpu.vector_store %arg4[%c0_5, %c0_6], %5 {strides = array<i32>} : memref<16x128xf32, #tpu.memory_space<vmem>>, vector<16x128xf32>,
    return
  }
  func.func @transform_0(%arg0: i32) -> (i32, i32) {
    %c0_i32 = arith.constant 0 : i32
    %c0_i32_0 = arith.constant 0 : i32
    return %arg0, %c0_i32 : i32, i32
  }
  func.func @transform_1(%arg0: i32) -> (i32, i32) {
    %c0_i32 = arith.constant 0 : i32
    %c0_i32_0 = arith.constant 0 : i32
    %c0_i32_1 = arith.constant 0 : i32
    return %c0_i32, %c0_i32_0 : i32, i32
  }
  func.func @transform_2(%arg0: i32) -> (i32, i32) {
    %c0_i32 = arith.constant 0 : i32
    %c0_i32_0 = arith.constant 0 : i32
    %c0_i32_1 = arith.constant 0 : i32
    return %c0_i32, %c0_i32_0 : i32, i32
  }
  func.func @transform_3(%arg0: i32) -> (i32, i32) {
    %c0_i32 = arith.constant 0 : i32
    %c0_i32_0 = arith.constant 0 : i32
    return %arg0, %c0_i32 : i32, i32
  }
}

module attributes {stable_mosaic.version = 11 : i64} {
  func.func @_lstm_recurrence_kernel(%arg0: i32, %arg1: memref<8x2x128xf32, #tpu.memory_space<vmem>>, %arg2: memref<32x128xf32, #tpu.memory_space<vmem>>, %arg3: memref<8x2x32xf32, #tpu.memory_space<vmem>>, %arg4: memref<2x32xf32, #tpu.memory_space<vmem>>, %arg5: memref<2x32xf32, #tpu.memory_space<vmem>>, %arg6: memref<2x32xf32, #tpu.memory_space<vmem>>, %arg7: memref<2x32xf32, #tpu.memory_space<vmem>>) attributes {dimension_semantics = [#tpu.dimension_semantics<arbitrary>], iteration_bounds = array<i64: 1>, scalar_prefetch = 0 : i64, scratch_operands = 2 : i64, tpu.core_type = #tpu.core_type<tc>, window_params = [{transform_indices = @transform_0, window_bounds = array<i64: 8, 2, 128>}, {pipeline_mode = #tpu.pipeline_mode<synchronous>, transform_indices = @transform_1, window_bounds = array<i64: 32, 128>}, {transform_indices = @transform_2, window_bounds = array<i64: 8, 2, 32>}, {pipeline_mode = #tpu.pipeline_mode<synchronous>, transform_indices = @transform_3, window_bounds = array<i64: 2, 32>}, {pipeline_mode = #tpu.pipeline_mode<synchronous>, transform_indices = @transform_4, window_bounds = array<i64: 2, 32>}]} {
    %c0_i32 = arith.constant 0 : i32
    %0 = arith.cmpi eq, %arg0, %c0_i32 : i32
    %1 = arith.extui %0 : i1 to i32
    %c0_i32_0 = arith.constant 0 : i32
    %2 = arith.cmpi ne, %1, %c0_i32_0 : i32
    scf.if %2 {
      %cst_116 = arith.constant 0.000000e+00 : f32
      %239 = vector.broadcast %cst_116 : f32 to vector<2x32xf32>
      %c0_117 = arith.constant 0 : index
      %c0_118 = arith.constant 0 : index
      %240 = vector.load %arg6[%c0_117, %c0_118] : memref<2x32xf32, #tpu.memory_space<vmem>>, vector<2x32xf32>
      tpu.vector_store %arg6[%c0_117, %c0_118], %239 {strides = array<i32>} : memref<2x32xf32, #tpu.memory_space<vmem>>, vector<2x32xf32>,
      %cst_119 = arith.constant 0.000000e+00 : f32
      %241 = vector.broadcast %cst_119 : f32 to vector<2x32xf32>
      %c0_120 = arith.constant 0 : index
      %c0_121 = arith.constant 0 : index
      %242 = vector.load %arg7[%c0_120, %c0_121] : memref<2x32xf32, #tpu.memory_space<vmem>>, vector<2x32xf32>
      tpu.vector_store %arg7[%c0_120, %c0_121], %241 {strides = array<i32>} : memref<2x32xf32, #tpu.memory_space<vmem>>, vector<2x32xf32>,
    } else {
    }
    %c0 = arith.constant 0 : index
    %c0_1 = arith.constant 0 : index
    %3 = vector.load %arg2[%c0, %c0_1] : memref<32x128xf32, #tpu.memory_space<vmem>>, vector<32x128xf32>
    %c0_i32_2 = arith.constant 0 : i32
    %4 = arith.index_cast %c0_i32_2 : i32 to index
    %c0_3 = arith.constant 0 : index
    %c0_4 = arith.constant 0 : index
    %5 = vector.load %arg1[%4, %c0_3, %c0_4] : memref<8x2x128xf32, #tpu.memory_space<vmem>>, vector<1x2x128xf32>
    %6 = vector.shape_cast %5 : vector<1x2x128xf32> to vector<2x128xf32>
    %c0_5 = arith.constant 0 : index
    %c0_6 = arith.constant 0 : index
    %7 = vector.load %arg6[%c0_5, %c0_6] : memref<2x32xf32, #tpu.memory_space<vmem>>, vector<2x32xf32>
    %cst = arith.constant dense<0.000000e+00> : vector<2x128xf32>
    %8 = tpu.matmul %7, %3, %cst {dimension_numbers = #tpu.dot_dimension_numbers<[1], [0], [0], [1], [0, 0, 1, 1], [], []>} : vector<2x32xf32>, vector<32x128xf32>, vector<2x128xf32> -> vector<2x128xf32>
    %9 = arith.addf %6, %8 : vector<2x128xf32>
    %10 = vector.extract_strided_slice %9 {offsets = [0, 0], sizes = [2, 32], strides = [1, 1]} : vector<2x128xf32> to vector<2x32xf32>
    %11 = math.tanh %10 : vector<2x32xf32>
    %12 = vector.extract_strided_slice %9 {offsets = [0, 32], sizes = [2, 96], strides = [1, 1]} : vector<2x128xf32> to vector<2x96xf32>
    %13 = arith.negf %12 : vector<2x96xf32>
    %14 = math.exp %13 : vector<2x96xf32>
    %cst_7 = arith.constant 1.000000e+00 : f32
    %15 = vector.broadcast %cst_7 : f32 to vector<2x96xf32>
    %16 = arith.addf %15, %14 : vector<2x96xf32>
    %17 = arith.divf %15, %16 : vector<2x96xf32>
    %18 = vector.extract_strided_slice %17 {offsets = [0, 0], sizes = [2, 32], strides = [1, 1]} : vector<2x96xf32> to vector<2x32xf32>
    %19 = vector.extract_strided_slice %17 {offsets = [0, 32], sizes = [2, 32], strides = [1, 1]} : vector<2x96xf32> to vector<2x32xf32>
    %20 = vector.extract_strided_slice %17 {offsets = [0, 64], sizes = [2, 32], strides = [1, 1]} : vector<2x96xf32> to vector<2x32xf32>
    %c0_8 = arith.constant 0 : index
    %c0_9 = arith.constant 0 : index
    %21 = vector.load %arg7[%c0_8, %c0_9] : memref<2x32xf32, #tpu.memory_space<vmem>>, vector<2x32xf32>
    %22 = arith.mulf %18, %21 : vector<2x32xf32>
    %23 = arith.mulf %19, %11 : vector<2x32xf32>
    %24 = arith.addf %22, %23 : vector<2x32xf32>
    %25 = math.tanh %24 : vector<2x32xf32>
    %26 = arith.mulf %20, %25 : vector<2x32xf32>
    %c0_10 = arith.constant 0 : index
    %c0_11 = arith.constant 0 : index
    %27 = vector.load %arg6[%c0_10, %c0_11] : memref<2x32xf32, #tpu.memory_space<vmem>>, vector<2x32xf32>
    tpu.vector_store %arg6[%c0_10, %c0_11], %26 {strides = array<i32>} : memref<2x32xf32, #tpu.memory_space<vmem>>, vector<2x32xf32>,
    %c0_12 = arith.constant 0 : index
    %c0_13 = arith.constant 0 : index
    %28 = vector.load %arg7[%c0_12, %c0_13] : memref<2x32xf32, #tpu.memory_space<vmem>>, vector<2x32xf32>
    tpu.vector_store %arg7[%c0_12, %c0_13], %24 {strides = array<i32>} : memref<2x32xf32, #tpu.memory_space<vmem>>, vector<2x32xf32>,
    %29 = arith.index_cast %c0_i32_2 : i32 to index
    %c0_14 = arith.constant 0 : index
    %c0_15 = arith.constant 0 : index
    %30 = vector.load %arg3[%29, %c0_14, %c0_15] : memref<8x2x32xf32, #tpu.memory_space<vmem>>, vector<1x2x32xf32>
    %31 = vector.shape_cast %30 : vector<1x2x32xf32> to vector<2x32xf32>
    %32 = vector.shape_cast %26 : vector<2x32xf32> to vector<1x2x32xf32>
    tpu.vector_store %arg3[%29, %c0_14, %c0_15], %32 {strides = array<i32>} : memref<8x2x32xf32, #tpu.memory_space<vmem>>, vector<1x2x32xf32>,
    %c1_i32 = arith.constant 1 : i32
    %33 = arith.index_cast %c1_i32 : i32 to index
    %c0_16 = arith.constant 0 : index
    %c0_17 = arith.constant 0 : index
    %34 = vector.load %arg1[%33, %c0_16, %c0_17] : memref<8x2x128xf32, #tpu.memory_space<vmem>>, vector<1x2x128xf32>
    %35 = vector.shape_cast %34 : vector<1x2x128xf32> to vector<2x128xf32>
    %c0_18 = arith.constant 0 : index
    %c0_19 = arith.constant 0 : index
    %36 = vector.load %arg6[%c0_18, %c0_19] : memref<2x32xf32, #tpu.memory_space<vmem>>, vector<2x32xf32>
    %cst_20 = arith.constant dense<0.000000e+00> : vector<2x128xf32>
    %37 = tpu.matmul %36, %3, %cst_20 {dimension_numbers = #tpu.dot_dimension_numbers<[1], [0], [0], [1], [0, 0, 1, 1], [], []>} : vector<2x32xf32>, vector<32x128xf32>, vector<2x128xf32> -> vector<2x128xf32>
    %38 = arith.addf %35, %37 : vector<2x128xf32>
    %39 = vector.extract_strided_slice %38 {offsets = [0, 0], sizes = [2, 32], strides = [1, 1]} : vector<2x128xf32> to vector<2x32xf32>
    %40 = math.tanh %39 : vector<2x32xf32>
    %41 = vector.extract_strided_slice %38 {offsets = [0, 32], sizes = [2, 96], strides = [1, 1]} : vector<2x128xf32> to vector<2x96xf32>
    %42 = arith.negf %41 : vector<2x96xf32>
    %43 = math.exp %42 : vector<2x96xf32>
    %cst_21 = arith.constant 1.000000e+00 : f32
    %44 = vector.broadcast %cst_21 : f32 to vector<2x96xf32>
    %45 = arith.addf %44, %43 : vector<2x96xf32>
    %46 = arith.divf %44, %45 : vector<2x96xf32>
    %47 = vector.extract_strided_slice %46 {offsets = [0, 0], sizes = [2, 32], strides = [1, 1]} : vector<2x96xf32> to vector<2x32xf32>
    %48 = vector.extract_strided_slice %46 {offsets = [0, 32], sizes = [2, 32], strides = [1, 1]} : vector<2x96xf32> to vector<2x32xf32>
    %49 = vector.extract_strided_slice %46 {offsets = [0, 64], sizes = [2, 32], strides = [1, 1]} : vector<2x96xf32> to vector<2x32xf32>
    %c0_22 = arith.constant 0 : index
    %c0_23 = arith.constant 0 : index
    %50 = vector.load %arg7[%c0_22, %c0_23] : memref<2x32xf32, #tpu.memory_space<vmem>>, vector<2x32xf32>
    %51 = arith.mulf %47, %50 : vector<2x32xf32>
    %52 = arith.mulf %48, %40 : vector<2x32xf32>
    %53 = arith.addf %51, %52 : vector<2x32xf32>
    %54 = math.tanh %53 : vector<2x32xf32>
    %55 = arith.mulf %49, %54 : vector<2x32xf32>
    %c0_24 = arith.constant 0 : index
    %c0_25 = arith.constant 0 : index
    %56 = vector.load %arg6[%c0_24, %c0_25] : memref<2x32xf32, #tpu.memory_space<vmem>>, vector<2x32xf32>
    tpu.vector_store %arg6[%c0_24, %c0_25], %55 {strides = array<i32>} : memref<2x32xf32, #tpu.memory_space<vmem>>, vector<2x32xf32>,
    %c0_26 = arith.constant 0 : index
    %c0_27 = arith.constant 0 : index
    %57 = vector.load %arg7[%c0_26, %c0_27] : memref<2x32xf32, #tpu.memory_space<vmem>>, vector<2x32xf32>
    tpu.vector_store %arg7[%c0_26, %c0_27], %53 {strides = array<i32>} : memref<2x32xf32, #tpu.memory_space<vmem>>, vector<2x32xf32>,
    %58 = arith.index_cast %c1_i32 : i32 to index
    %c0_28 = arith.constant 0 : index
    %c0_29 = arith.constant 0 : index
    %59 = vector.load %arg3[%58, %c0_28, %c0_29] : memref<8x2x32xf32, #tpu.memory_space<vmem>>, vector<1x2x32xf32>
    %60 = vector.shape_cast %59 : vector<1x2x32xf32> to vector<2x32xf32>
    %61 = vector.shape_cast %55 : vector<2x32xf32> to vector<1x2x32xf32>
    tpu.vector_store %arg3[%58, %c0_28, %c0_29], %61 {strides = array<i32>} : memref<8x2x32xf32, #tpu.memory_space<vmem>>, vector<1x2x32xf32>,
    %c2_i32 = arith.constant 2 : i32
    %62 = arith.index_cast %c2_i32 : i32 to index
    %c0_30 = arith.constant 0 : index
    %c0_31 = arith.constant 0 : index
    %63 = vector.load %arg1[%62, %c0_30, %c0_31] : memref<8x2x128xf32, #tpu.memory_space<vmem>>, vector<1x2x128xf32>
    %64 = vector.shape_cast %63 : vector<1x2x128xf32> to vector<2x128xf32>
    %c0_32 = arith.constant 0 : index
    %c0_33 = arith.constant 0 : index
    %65 = vector.load %arg6[%c0_32, %c0_33] : memref<2x32xf32, #tpu.memory_space<vmem>>, vector<2x32xf32>
    %cst_34 = arith.constant dense<0.000000e+00> : vector<2x128xf32>
    %66 = tpu.matmul %65, %3, %cst_34 {dimension_numbers = #tpu.dot_dimension_numbers<[1], [0], [0], [1], [0, 0, 1, 1], [], []>} : vector<2x32xf32>, vector<32x128xf32>, vector<2x128xf32> -> vector<2x128xf32>
    %67 = arith.addf %64, %66 : vector<2x128xf32>
    %68 = vector.extract_strided_slice %67 {offsets = [0, 0], sizes = [2, 32], strides = [1, 1]} : vector<2x128xf32> to vector<2x32xf32>
    %69 = math.tanh %68 : vector<2x32xf32>
    %70 = vector.extract_strided_slice %67 {offsets = [0, 32], sizes = [2, 96], strides = [1, 1]} : vector<2x128xf32> to vector<2x96xf32>
    %71 = arith.negf %70 : vector<2x96xf32>
    %72 = math.exp %71 : vector<2x96xf32>
    %cst_35 = arith.constant 1.000000e+00 : f32
    %73 = vector.broadcast %cst_35 : f32 to vector<2x96xf32>
    %74 = arith.addf %73, %72 : vector<2x96xf32>
    %75 = arith.divf %73, %74 : vector<2x96xf32>
    %76 = vector.extract_strided_slice %75 {offsets = [0, 0], sizes = [2, 32], strides = [1, 1]} : vector<2x96xf32> to vector<2x32xf32>
    %77 = vector.extract_strided_slice %75 {offsets = [0, 32], sizes = [2, 32], strides = [1, 1]} : vector<2x96xf32> to vector<2x32xf32>
    %78 = vector.extract_strided_slice %75 {offsets = [0, 64], sizes = [2, 32], strides = [1, 1]} : vector<2x96xf32> to vector<2x32xf32>
    %c0_36 = arith.constant 0 : index
    %c0_37 = arith.constant 0 : index
    %79 = vector.load %arg7[%c0_36, %c0_37] : memref<2x32xf32, #tpu.memory_space<vmem>>, vector<2x32xf32>
    %80 = arith.mulf %76, %79 : vector<2x32xf32>
    %81 = arith.mulf %77, %69 : vector<2x32xf32>
    %82 = arith.addf %80, %81 : vector<2x32xf32>
    %83 = math.tanh %82 : vector<2x32xf32>
    %84 = arith.mulf %78, %83 : vector<2x32xf32>
    %c0_38 = arith.constant 0 : index
    %c0_39 = arith.constant 0 : index
    %85 = vector.load %arg6[%c0_38, %c0_39] : memref<2x32xf32, #tpu.memory_space<vmem>>, vector<2x32xf32>
    tpu.vector_store %arg6[%c0_38, %c0_39], %84 {strides = array<i32>} : memref<2x32xf32, #tpu.memory_space<vmem>>, vector<2x32xf32>,
    %c0_40 = arith.constant 0 : index
    %c0_41 = arith.constant 0 : index
    %86 = vector.load %arg7[%c0_40, %c0_41] : memref<2x32xf32, #tpu.memory_space<vmem>>, vector<2x32xf32>
    tpu.vector_store %arg7[%c0_40, %c0_41], %82 {strides = array<i32>} : memref<2x32xf32, #tpu.memory_space<vmem>>, vector<2x32xf32>,
    %87 = arith.index_cast %c2_i32 : i32 to index
    %c0_42 = arith.constant 0 : index
    %c0_43 = arith.constant 0 : index
    %88 = vector.load %arg3[%87, %c0_42, %c0_43] : memref<8x2x32xf32, #tpu.memory_space<vmem>>, vector<1x2x32xf32>
    %89 = vector.shape_cast %88 : vector<1x2x32xf32> to vector<2x32xf32>
    %90 = vector.shape_cast %84 : vector<2x32xf32> to vector<1x2x32xf32>
    tpu.vector_store %arg3[%87, %c0_42, %c0_43], %90 {strides = array<i32>} : memref<8x2x32xf32, #tpu.memory_space<vmem>>, vector<1x2x32xf32>,
    %c3_i32 = arith.constant 3 : i32
    %91 = arith.index_cast %c3_i32 : i32 to index
    %c0_44 = arith.constant 0 : index
    %c0_45 = arith.constant 0 : index
    %92 = vector.load %arg1[%91, %c0_44, %c0_45] : memref<8x2x128xf32, #tpu.memory_space<vmem>>, vector<1x2x128xf32>
    %93 = vector.shape_cast %92 : vector<1x2x128xf32> to vector<2x128xf32>
    %c0_46 = arith.constant 0 : index
    %c0_47 = arith.constant 0 : index
    %94 = vector.load %arg6[%c0_46, %c0_47] : memref<2x32xf32, #tpu.memory_space<vmem>>, vector<2x32xf32>
    %cst_48 = arith.constant dense<0.000000e+00> : vector<2x128xf32>
    %95 = tpu.matmul %94, %3, %cst_48 {dimension_numbers = #tpu.dot_dimension_numbers<[1], [0], [0], [1], [0, 0, 1, 1], [], []>} : vector<2x32xf32>, vector<32x128xf32>, vector<2x128xf32> -> vector<2x128xf32>
    %96 = arith.addf %93, %95 : vector<2x128xf32>
    %97 = vector.extract_strided_slice %96 {offsets = [0, 0], sizes = [2, 32], strides = [1, 1]} : vector<2x128xf32> to vector<2x32xf32>
    %98 = math.tanh %97 : vector<2x32xf32>
    %99 = vector.extract_strided_slice %96 {offsets = [0, 32], sizes = [2, 96], strides = [1, 1]} : vector<2x128xf32> to vector<2x96xf32>
    %100 = arith.negf %99 : vector<2x96xf32>
    %101 = math.exp %100 : vector<2x96xf32>
    %cst_49 = arith.constant 1.000000e+00 : f32
    %102 = vector.broadcast %cst_49 : f32 to vector<2x96xf32>
    %103 = arith.addf %102, %101 : vector<2x96xf32>
    %104 = arith.divf %102, %103 : vector<2x96xf32>
    %105 = vector.extract_strided_slice %104 {offsets = [0, 0], sizes = [2, 32], strides = [1, 1]} : vector<2x96xf32> to vector<2x32xf32>
    %106 = vector.extract_strided_slice %104 {offsets = [0, 32], sizes = [2, 32], strides = [1, 1]} : vector<2x96xf32> to vector<2x32xf32>
    %107 = vector.extract_strided_slice %104 {offsets = [0, 64], sizes = [2, 32], strides = [1, 1]} : vector<2x96xf32> to vector<2x32xf32>
    %c0_50 = arith.constant 0 : index
    %c0_51 = arith.constant 0 : index
    %108 = vector.load %arg7[%c0_50, %c0_51] : memref<2x32xf32, #tpu.memory_space<vmem>>, vector<2x32xf32>
    %109 = arith.mulf %105, %108 : vector<2x32xf32>
    %110 = arith.mulf %106, %98 : vector<2x32xf32>
    %111 = arith.addf %109, %110 : vector<2x32xf32>
    %112 = math.tanh %111 : vector<2x32xf32>
    %113 = arith.mulf %107, %112 : vector<2x32xf32>
    %c0_52 = arith.constant 0 : index
    %c0_53 = arith.constant 0 : index
    %114 = vector.load %arg6[%c0_52, %c0_53] : memref<2x32xf32, #tpu.memory_space<vmem>>, vector<2x32xf32>
    tpu.vector_store %arg6[%c0_52, %c0_53], %113 {strides = array<i32>} : memref<2x32xf32, #tpu.memory_space<vmem>>, vector<2x32xf32>,
    %c0_54 = arith.constant 0 : index
    %c0_55 = arith.constant 0 : index
    %115 = vector.load %arg7[%c0_54, %c0_55] : memref<2x32xf32, #tpu.memory_space<vmem>>, vector<2x32xf32>
    tpu.vector_store %arg7[%c0_54, %c0_55], %111 {strides = array<i32>} : memref<2x32xf32, #tpu.memory_space<vmem>>, vector<2x32xf32>,
    %116 = arith.index_cast %c3_i32 : i32 to index
    %c0_56 = arith.constant 0 : index
    %c0_57 = arith.constant 0 : index
    %117 = vector.load %arg3[%116, %c0_56, %c0_57] : memref<8x2x32xf32, #tpu.memory_space<vmem>>, vector<1x2x32xf32>
    %118 = vector.shape_cast %117 : vector<1x2x32xf32> to vector<2x32xf32>
    %119 = vector.shape_cast %113 : vector<2x32xf32> to vector<1x2x32xf32>
    tpu.vector_store %arg3[%116, %c0_56, %c0_57], %119 {strides = array<i32>} : memref<8x2x32xf32, #tpu.memory_space<vmem>>, vector<1x2x32xf32>,
    %c4_i32 = arith.constant 4 : i32
    %120 = arith.index_cast %c4_i32 : i32 to index
    %c0_58 = arith.constant 0 : index
    %c0_59 = arith.constant 0 : index
    %121 = vector.load %arg1[%120, %c0_58, %c0_59] : memref<8x2x128xf32, #tpu.memory_space<vmem>>, vector<1x2x128xf32>
    %122 = vector.shape_cast %121 : vector<1x2x128xf32> to vector<2x128xf32>
    %c0_60 = arith.constant 0 : index
    %c0_61 = arith.constant 0 : index
    %123 = vector.load %arg6[%c0_60, %c0_61] : memref<2x32xf32, #tpu.memory_space<vmem>>, vector<2x32xf32>
    %cst_62 = arith.constant dense<0.000000e+00> : vector<2x128xf32>
    %124 = tpu.matmul %123, %3, %cst_62 {dimension_numbers = #tpu.dot_dimension_numbers<[1], [0], [0], [1], [0, 0, 1, 1], [], []>} : vector<2x32xf32>, vector<32x128xf32>, vector<2x128xf32> -> vector<2x128xf32>
    %125 = arith.addf %122, %124 : vector<2x128xf32>
    %126 = vector.extract_strided_slice %125 {offsets = [0, 0], sizes = [2, 32], strides = [1, 1]} : vector<2x128xf32> to vector<2x32xf32>
    %127 = math.tanh %126 : vector<2x32xf32>
    %128 = vector.extract_strided_slice %125 {offsets = [0, 32], sizes = [2, 96], strides = [1, 1]} : vector<2x128xf32> to vector<2x96xf32>
    %129 = arith.negf %128 : vector<2x96xf32>
    %130 = math.exp %129 : vector<2x96xf32>
    %cst_63 = arith.constant 1.000000e+00 : f32
    %131 = vector.broadcast %cst_63 : f32 to vector<2x96xf32>
    %132 = arith.addf %131, %130 : vector<2x96xf32>
    %133 = arith.divf %131, %132 : vector<2x96xf32>
    %134 = vector.extract_strided_slice %133 {offsets = [0, 0], sizes = [2, 32], strides = [1, 1]} : vector<2x96xf32> to vector<2x32xf32>
    %135 = vector.extract_strided_slice %133 {offsets = [0, 32], sizes = [2, 32], strides = [1, 1]} : vector<2x96xf32> to vector<2x32xf32>
    %136 = vector.extract_strided_slice %133 {offsets = [0, 64], sizes = [2, 32], strides = [1, 1]} : vector<2x96xf32> to vector<2x32xf32>
    %c0_64 = arith.constant 0 : index
    %c0_65 = arith.constant 0 : index
    %137 = vector.load %arg7[%c0_64, %c0_65] : memref<2x32xf32, #tpu.memory_space<vmem>>, vector<2x32xf32>
    %138 = arith.mulf %134, %137 : vector<2x32xf32>
    %139 = arith.mulf %135, %127 : vector<2x32xf32>
    %140 = arith.addf %138, %139 : vector<2x32xf32>
    %141 = math.tanh %140 : vector<2x32xf32>
    %142 = arith.mulf %136, %141 : vector<2x32xf32>
    %c0_66 = arith.constant 0 : index
    %c0_67 = arith.constant 0 : index
    %143 = vector.load %arg6[%c0_66, %c0_67] : memref<2x32xf32, #tpu.memory_space<vmem>>, vector<2x32xf32>
    tpu.vector_store %arg6[%c0_66, %c0_67], %142 {strides = array<i32>} : memref<2x32xf32, #tpu.memory_space<vmem>>, vector<2x32xf32>,
    %c0_68 = arith.constant 0 : index
    %c0_69 = arith.constant 0 : index
    %144 = vector.load %arg7[%c0_68, %c0_69] : memref<2x32xf32, #tpu.memory_space<vmem>>, vector<2x32xf32>
    tpu.vector_store %arg7[%c0_68, %c0_69], %140 {strides = array<i32>} : memref<2x32xf32, #tpu.memory_space<vmem>>, vector<2x32xf32>,
    %145 = arith.index_cast %c4_i32 : i32 to index
    %c0_70 = arith.constant 0 : index
    %c0_71 = arith.constant 0 : index
    %146 = vector.load %arg3[%145, %c0_70, %c0_71] : memref<8x2x32xf32, #tpu.memory_space<vmem>>, vector<1x2x32xf32>
    %147 = vector.shape_cast %146 : vector<1x2x32xf32> to vector<2x32xf32>
    %148 = vector.shape_cast %142 : vector<2x32xf32> to vector<1x2x32xf32>
    tpu.vector_store %arg3[%145, %c0_70, %c0_71], %148 {strides = array<i32>} : memref<8x2x32xf32, #tpu.memory_space<vmem>>, vector<1x2x32xf32>,
    %c5_i32 = arith.constant 5 : i32
    %149 = arith.index_cast %c5_i32 : i32 to index
    %c0_72 = arith.constant 0 : index
    %c0_73 = arith.constant 0 : index
    %150 = vector.load %arg1[%149, %c0_72, %c0_73] : memref<8x2x128xf32, #tpu.memory_space<vmem>>, vector<1x2x128xf32>
    %151 = vector.shape_cast %150 : vector<1x2x128xf32> to vector<2x128xf32>
    %c0_74 = arith.constant 0 : index
    %c0_75 = arith.constant 0 : index
    %152 = vector.load %arg6[%c0_74, %c0_75] : memref<2x32xf32, #tpu.memory_space<vmem>>, vector<2x32xf32>
    %cst_76 = arith.constant dense<0.000000e+00> : vector<2x128xf32>
    %153 = tpu.matmul %152, %3, %cst_76 {dimension_numbers = #tpu.dot_dimension_numbers<[1], [0], [0], [1], [0, 0, 1, 1], [], []>} : vector<2x32xf32>, vector<32x128xf32>, vector<2x128xf32> -> vector<2x128xf32>
    %154 = arith.addf %151, %153 : vector<2x128xf32>
    %155 = vector.extract_strided_slice %154 {offsets = [0, 0], sizes = [2, 32], strides = [1, 1]} : vector<2x128xf32> to vector<2x32xf32>
    %156 = math.tanh %155 : vector<2x32xf32>
    %157 = vector.extract_strided_slice %154 {offsets = [0, 32], sizes = [2, 96], strides = [1, 1]} : vector<2x128xf32> to vector<2x96xf32>
    %158 = arith.negf %157 : vector<2x96xf32>
    %159 = math.exp %158 : vector<2x96xf32>
    %cst_77 = arith.constant 1.000000e+00 : f32
    %160 = vector.broadcast %cst_77 : f32 to vector<2x96xf32>
    %161 = arith.addf %160, %159 : vector<2x96xf32>
    %162 = arith.divf %160, %161 : vector<2x96xf32>
    %163 = vector.extract_strided_slice %162 {offsets = [0, 0], sizes = [2, 32], strides = [1, 1]} : vector<2x96xf32> to vector<2x32xf32>
    %164 = vector.extract_strided_slice %162 {offsets = [0, 32], sizes = [2, 32], strides = [1, 1]} : vector<2x96xf32> to vector<2x32xf32>
    %165 = vector.extract_strided_slice %162 {offsets = [0, 64], sizes = [2, 32], strides = [1, 1]} : vector<2x96xf32> to vector<2x32xf32>
    %c0_78 = arith.constant 0 : index
    %c0_79 = arith.constant 0 : index
    %166 = vector.load %arg7[%c0_78, %c0_79] : memref<2x32xf32, #tpu.memory_space<vmem>>, vector<2x32xf32>
    %167 = arith.mulf %163, %166 : vector<2x32xf32>
    %168 = arith.mulf %164, %156 : vector<2x32xf32>
    %169 = arith.addf %167, %168 : vector<2x32xf32>
    %170 = math.tanh %169 : vector<2x32xf32>
    %171 = arith.mulf %165, %170 : vector<2x32xf32>
    %c0_80 = arith.constant 0 : index
    %c0_81 = arith.constant 0 : index
    %172 = vector.load %arg6[%c0_80, %c0_81] : memref<2x32xf32, #tpu.memory_space<vmem>>, vector<2x32xf32>
    tpu.vector_store %arg6[%c0_80, %c0_81], %171 {strides = array<i32>} : memref<2x32xf32, #tpu.memory_space<vmem>>, vector<2x32xf32>,
    %c0_82 = arith.constant 0 : index
    %c0_83 = arith.constant 0 : index
    %173 = vector.load %arg7[%c0_82, %c0_83] : memref<2x32xf32, #tpu.memory_space<vmem>>, vector<2x32xf32>
    tpu.vector_store %arg7[%c0_82, %c0_83], %169 {strides = array<i32>} : memref<2x32xf32, #tpu.memory_space<vmem>>, vector<2x32xf32>,
    %174 = arith.index_cast %c5_i32 : i32 to index
    %c0_84 = arith.constant 0 : index
    %c0_85 = arith.constant 0 : index
    %175 = vector.load %arg3[%174, %c0_84, %c0_85] : memref<8x2x32xf32, #tpu.memory_space<vmem>>, vector<1x2x32xf32>
    %176 = vector.shape_cast %175 : vector<1x2x32xf32> to vector<2x32xf32>
    %177 = vector.shape_cast %171 : vector<2x32xf32> to vector<1x2x32xf32>
    tpu.vector_store %arg3[%174, %c0_84, %c0_85], %177 {strides = array<i32>} : memref<8x2x32xf32, #tpu.memory_space<vmem>>, vector<1x2x32xf32>,
    %c6_i32 = arith.constant 6 : i32
    %178 = arith.index_cast %c6_i32 : i32 to index
    %c0_86 = arith.constant 0 : index
    %c0_87 = arith.constant 0 : index
    %179 = vector.load %arg1[%178, %c0_86, %c0_87] : memref<8x2x128xf32, #tpu.memory_space<vmem>>, vector<1x2x128xf32>
    %180 = vector.shape_cast %179 : vector<1x2x128xf32> to vector<2x128xf32>
    %c0_88 = arith.constant 0 : index
    %c0_89 = arith.constant 0 : index
    %181 = vector.load %arg6[%c0_88, %c0_89] : memref<2x32xf32, #tpu.memory_space<vmem>>, vector<2x32xf32>
    %cst_90 = arith.constant dense<0.000000e+00> : vector<2x128xf32>
    %182 = tpu.matmul %181, %3, %cst_90 {dimension_numbers = #tpu.dot_dimension_numbers<[1], [0], [0], [1], [0, 0, 1, 1], [], []>} : vector<2x32xf32>, vector<32x128xf32>, vector<2x128xf32> -> vector<2x128xf32>
    %183 = arith.addf %180, %182 : vector<2x128xf32>
    %184 = vector.extract_strided_slice %183 {offsets = [0, 0], sizes = [2, 32], strides = [1, 1]} : vector<2x128xf32> to vector<2x32xf32>
    %185 = math.tanh %184 : vector<2x32xf32>
    %186 = vector.extract_strided_slice %183 {offsets = [0, 32], sizes = [2, 96], strides = [1, 1]} : vector<2x128xf32> to vector<2x96xf32>
    %187 = arith.negf %186 : vector<2x96xf32>
    %188 = math.exp %187 : vector<2x96xf32>
    %cst_91 = arith.constant 1.000000e+00 : f32
    %189 = vector.broadcast %cst_91 : f32 to vector<2x96xf32>
    %190 = arith.addf %189, %188 : vector<2x96xf32>
    %191 = arith.divf %189, %190 : vector<2x96xf32>
    %192 = vector.extract_strided_slice %191 {offsets = [0, 0], sizes = [2, 32], strides = [1, 1]} : vector<2x96xf32> to vector<2x32xf32>
    %193 = vector.extract_strided_slice %191 {offsets = [0, 32], sizes = [2, 32], strides = [1, 1]} : vector<2x96xf32> to vector<2x32xf32>
    %194 = vector.extract_strided_slice %191 {offsets = [0, 64], sizes = [2, 32], strides = [1, 1]} : vector<2x96xf32> to vector<2x32xf32>
    %c0_92 = arith.constant 0 : index
    %c0_93 = arith.constant 0 : index
    %195 = vector.load %arg7[%c0_92, %c0_93] : memref<2x32xf32, #tpu.memory_space<vmem>>, vector<2x32xf32>
    %196 = arith.mulf %192, %195 : vector<2x32xf32>
    %197 = arith.mulf %193, %185 : vector<2x32xf32>
    %198 = arith.addf %196, %197 : vector<2x32xf32>
    %199 = math.tanh %198 : vector<2x32xf32>
    %200 = arith.mulf %194, %199 : vector<2x32xf32>
    %c0_94 = arith.constant 0 : index
    %c0_95 = arith.constant 0 : index
    %201 = vector.load %arg6[%c0_94, %c0_95] : memref<2x32xf32, #tpu.memory_space<vmem>>, vector<2x32xf32>
    tpu.vector_store %arg6[%c0_94, %c0_95], %200 {strides = array<i32>} : memref<2x32xf32, #tpu.memory_space<vmem>>, vector<2x32xf32>,
    %c0_96 = arith.constant 0 : index
    %c0_97 = arith.constant 0 : index
    %202 = vector.load %arg7[%c0_96, %c0_97] : memref<2x32xf32, #tpu.memory_space<vmem>>, vector<2x32xf32>
    tpu.vector_store %arg7[%c0_96, %c0_97], %198 {strides = array<i32>} : memref<2x32xf32, #tpu.memory_space<vmem>>, vector<2x32xf32>,
    %203 = arith.index_cast %c6_i32 : i32 to index
    %c0_98 = arith.constant 0 : index
    %c0_99 = arith.constant 0 : index
    %204 = vector.load %arg3[%203, %c0_98, %c0_99] : memref<8x2x32xf32, #tpu.memory_space<vmem>>, vector<1x2x32xf32>
    %205 = vector.shape_cast %204 : vector<1x2x32xf32> to vector<2x32xf32>
    %206 = vector.shape_cast %200 : vector<2x32xf32> to vector<1x2x32xf32>
    tpu.vector_store %arg3[%203, %c0_98, %c0_99], %206 {strides = array<i32>} : memref<8x2x32xf32, #tpu.memory_space<vmem>>, vector<1x2x32xf32>,
    %c7_i32 = arith.constant 7 : i32
    %207 = arith.index_cast %c7_i32 : i32 to index
    %c0_100 = arith.constant 0 : index
    %c0_101 = arith.constant 0 : index
    %208 = vector.load %arg1[%207, %c0_100, %c0_101] : memref<8x2x128xf32, #tpu.memory_space<vmem>>, vector<1x2x128xf32>
    %209 = vector.shape_cast %208 : vector<1x2x128xf32> to vector<2x128xf32>
    %c0_102 = arith.constant 0 : index
    %c0_103 = arith.constant 0 : index
    %210 = vector.load %arg6[%c0_102, %c0_103] : memref<2x32xf32, #tpu.memory_space<vmem>>, vector<2x32xf32>
    %cst_104 = arith.constant dense<0.000000e+00> : vector<2x128xf32>
    %211 = tpu.matmul %210, %3, %cst_104 {dimension_numbers = #tpu.dot_dimension_numbers<[1], [0], [0], [1], [0, 0, 1, 1], [], []>} : vector<2x32xf32>, vector<32x128xf32>, vector<2x128xf32> -> vector<2x128xf32>
    %212 = arith.addf %209, %211 : vector<2x128xf32>
    %213 = vector.extract_strided_slice %212 {offsets = [0, 0], sizes = [2, 32], strides = [1, 1]} : vector<2x128xf32> to vector<2x32xf32>
    %214 = math.tanh %213 : vector<2x32xf32>
    %215 = vector.extract_strided_slice %212 {offsets = [0, 32], sizes = [2, 96], strides = [1, 1]} : vector<2x128xf32> to vector<2x96xf32>
    %216 = arith.negf %215 : vector<2x96xf32>
    %217 = math.exp %216 : vector<2x96xf32>
    %cst_105 = arith.constant 1.000000e+00 : f32
    %218 = vector.broadcast %cst_105 : f32 to vector<2x96xf32>
    %219 = arith.addf %218, %217 : vector<2x96xf32>
    %220 = arith.divf %218, %219 : vector<2x96xf32>
    %221 = vector.extract_strided_slice %220 {offsets = [0, 0], sizes = [2, 32], strides = [1, 1]} : vector<2x96xf32> to vector<2x32xf32>
    %222 = vector.extract_strided_slice %220 {offsets = [0, 32], sizes = [2, 32], strides = [1, 1]} : vector<2x96xf32> to vector<2x32xf32>
    %223 = vector.extract_strided_slice %220 {offsets = [0, 64], sizes = [2, 32], strides = [1, 1]} : vector<2x96xf32> to vector<2x32xf32>
    %c0_106 = arith.constant 0 : index
    %c0_107 = arith.constant 0 : index
    %224 = vector.load %arg7[%c0_106, %c0_107] : memref<2x32xf32, #tpu.memory_space<vmem>>, vector<2x32xf32>
    %225 = arith.mulf %221, %224 : vector<2x32xf32>
    %226 = arith.mulf %222, %214 : vector<2x32xf32>
    %227 = arith.addf %225, %226 : vector<2x32xf32>
    %228 = math.tanh %227 : vector<2x32xf32>
    %229 = arith.mulf %223, %228 : vector<2x32xf32>
    %c0_108 = arith.constant 0 : index
    %c0_109 = arith.constant 0 : index
    %230 = vector.load %arg6[%c0_108, %c0_109] : memref<2x32xf32, #tpu.memory_space<vmem>>, vector<2x32xf32>
    tpu.vector_store %arg6[%c0_108, %c0_109], %229 {strides = array<i32>} : memref<2x32xf32, #tpu.memory_space<vmem>>, vector<2x32xf32>,
    %c0_110 = arith.constant 0 : index
    %c0_111 = arith.constant 0 : index
    %231 = vector.load %arg7[%c0_110, %c0_111] : memref<2x32xf32, #tpu.memory_space<vmem>>, vector<2x32xf32>
    tpu.vector_store %arg7[%c0_110, %c0_111], %227 {strides = array<i32>} : memref<2x32xf32, #tpu.memory_space<vmem>>, vector<2x32xf32>,
    %232 = arith.index_cast %c7_i32 : i32 to index
    %c0_112 = arith.constant 0 : index
    %c0_113 = arith.constant 0 : index
    %233 = vector.load %arg3[%232, %c0_112, %c0_113] : memref<8x2x32xf32, #tpu.memory_space<vmem>>, vector<1x2x32xf32>
    %234 = vector.shape_cast %233 : vector<1x2x32xf32> to vector<2x32xf32>
    %235 = vector.shape_cast %229 : vector<2x32xf32> to vector<1x2x32xf32>
    tpu.vector_store %arg3[%232, %c0_112, %c0_113], %235 {strides = array<i32>} : memref<8x2x32xf32, #tpu.memory_space<vmem>>, vector<1x2x32xf32>,
    %c8_i32 = arith.constant 8 : i32
    %c0_i32_114 = arith.constant 0 : i32
    %236 = arith.cmpi eq, %arg0, %c0_i32_114 : i32
    %237 = arith.extui %236 : i1 to i32
    %c0_i32_115 = arith.constant 0 : i32
    %238 = arith.cmpi ne, %237, %c0_i32_115 : i32
    scf.if %238 {
      %c0_116 = arith.constant 0 : index
      %c0_117 = arith.constant 0 : index
      %239 = vector.load %arg6[%c0_116, %c0_117] : memref<2x32xf32, #tpu.memory_space<vmem>>, vector<2x32xf32>
      %c0_118 = arith.constant 0 : index
      %c0_119 = arith.constant 0 : index
      %240 = vector.load %arg4[%c0_118, %c0_119] : memref<2x32xf32, #tpu.memory_space<vmem>>, vector<2x32xf32>
      tpu.vector_store %arg4[%c0_118, %c0_119], %239 {strides = array<i32>} : memref<2x32xf32, #tpu.memory_space<vmem>>, vector<2x32xf32>,
      %c0_120 = arith.constant 0 : index
      %c0_121 = arith.constant 0 : index
      %241 = vector.load %arg7[%c0_120, %c0_121] : memref<2x32xf32, #tpu.memory_space<vmem>>, vector<2x32xf32>
      %c0_122 = arith.constant 0 : index
      %c0_123 = arith.constant 0 : index
      %242 = vector.load %arg5[%c0_122, %c0_123] : memref<2x32xf32, #tpu.memory_space<vmem>>, vector<2x32xf32>
      tpu.vector_store %arg5[%c0_122, %c0_123], %241 {strides = array<i32>} : memref<2x32xf32, #tpu.memory_space<vmem>>, vector<2x32xf32>,
    } else {
    }
    return
  }
  func.func @transform_0(%arg0: i32) -> (i32, i32, i32) {
    %c0_i32 = arith.constant 0 : i32
    %c0_i32_0 = arith.constant 0 : i32
    %c0_i32_1 = arith.constant 0 : i32
    return %arg0, %c0_i32, %c0_i32_0 : i32, i32, i32
  }
  func.func @transform_1(%arg0: i32) -> (i32, i32) {
    %c0_i32 = arith.constant 0 : i32
    %c0_i32_0 = arith.constant 0 : i32
    %c0_i32_1 = arith.constant 0 : i32
    return %c0_i32, %c0_i32_0 : i32, i32
  }
  func.func @transform_2(%arg0: i32) -> (i32, i32, i32) {
    %c0_i32 = arith.constant 0 : i32
    %c0_i32_0 = arith.constant 0 : i32
    %c0_i32_1 = arith.constant 0 : i32
    return %arg0, %c0_i32, %c0_i32_0 : i32, i32, i32
  }
  func.func @transform_3(%arg0: i32) -> (i32, i32) {
    %c0_i32 = arith.constant 0 : i32
    %c0_i32_0 = arith.constant 0 : i32
    %c0_i32_1 = arith.constant 0 : i32
    return %c0_i32, %c0_i32_0 : i32, i32
  }
  func.func @transform_4(%arg0: i32) -> (i32, i32) {
    %c0_i32 = arith.constant 0 : i32
    %c0_i32_0 = arith.constant 0 : i32
    %c0_i32_1 = arith.constant 0 : i32
    return %c0_i32, %c0_i32_0 : i32, i32
  }
}

</mosaic_0001>

<bundles_post_ra>
// kernel: lstm_forward.2
= control target key start
LH: loop header
LB: loop body
LE: loop exit
PB: predicated region body
PF: predicated region fallthrough
CT: control target
= control target key end

     0   :  { %8 = vsyncpa [#allocation3], 0  ;;  %s109_s15 = smov [#allocation2]   ;;  %s110_s17 = smov 128   ;;  %s150_s0 = inlined_call_operand.vmem [shape: f32[16,16], index: 0, kind: input, shape index: {}]   ;;  %s151_s1 = inlined_call_operand.hbm [shape: f32[16,128], index: 1, kind: input, shape index: {}]   ;;  %s152_s2 = inlined_call_operand.vmem [shape: f32[1,128], index: 2, kind: input, shape index: {}]   ;;  %s153_s3 = inlined_call_operand.vmem [shape: f32[16,128], index: 3, kind: output, shape index: {}]  }
   0x1   :  { %s15_s14 = sshll.u32 %s151_s1, 4  ;;  %s17_s16 = sshll.u32 %s109_s15, 4  ;;  %s16_s14 = int_to_ptr.hbm [resolvable:$true] %s15_s14  ;;  %s18_s16 = int_to_ptr.vmem [resolvable:$true] %s17_s16 }
   0x2   :  { %s111_s18 = smov 8  }
   0x3   :  { %23 = dma.hbm_to_vmem [thread:$0]  %s16_s14, 256, %s18_s16, [#allocation3], %s110_s17, %s110_s17, %s111_s18  }
   0x4   :  { %107 = dma.done.wait [#allocation3], 256  }
   0x5   :  { %108 = vsyncadd [#allocation3], 4294967040  ;;  %v33_v0 = vld [vmem:[#allocation2 + $0x8] sm:$0xff]  ;;  %v32_v1 = vld [vmem:[#allocation2] sm:$0xff]  ;;  %vm38_vm0 = vcmask 130048  }
   0x6   :  { %59 = vmatpush.msra.mxu0 %v33_v0  ;;  %77 = vmatpush.msra.mxu1 %v33_v0  ;;  %v30_v2 = vld [vmem:[%s150_s0] sm:$0xff]  ;;  %v31_v3 = vld [vmem:[%s150_s0 + $0x8] sm:$0xff] }
   0x7   :  { %v82_v4 = vld [vmem:[%s152_s2] ss:$0 sm:$0xff] }
   0x8   :  { %60 = vmatpush.msra.mxu0 %v32_v1  ;;  %78 = vmatpush.msra.mxu1 %v32_v1 }
   0x9   :  { %75 = vmatmul.msk.f32.vlgmr.msra.gmra.mxu0 %vm38_vm0, %v30_v2  ;;  %76 = vmatmul.msk.f32.vlgmr.msra.gmra.mxu1 %vm38_vm0, %v31_v3 }
  0x86   :  { %v62_v5 = vpop.f32.mrf.mxu0  ;;  %v65_v6 = vpop.f32.mrf.mxu1 }
  0x87   :  { %v63_v7 = vadd.f32 %v82_v4, %v62_v5  ;;  %v66_v8 = vadd.f32 %v82_v4, %v65_v6 }
  0x89   :  { %68 = vst [vmem:[%s153_s3] sm:$0xff] %v63_v7 }
  0x8a   :  { %69 = vst [vmem:[%s153_s3 + $0x8] sm:$0xff] %v66_v8 }
  0x8b   :  { %74 = vsyncpa [#allocation3], 1 }

// kernel: lstm_forward.3
= control target key start
LH: loop header
LB: loop body
LE: loop exit
PB: predicated region body
PF: predicated region fallthrough
CT: control target
= control target key end

     0   :  { %10 = vsyncpa [#allocation5], 0  ;;  %vm20_vm0 = vcmask 254976   ;;  %v870_v2 = vmov 0.0   ;;  %s1051_s0 = inlined_call_operand.vmem [shape: f32[8,2,128], index: 0, kind: input, shape index: {}]   ;;  %s1052_s1 = inlined_call_operand.vmem [shape: f32[32,128], index: 1, kind: input, shape index: {}]   ;;  %s1053_s2 = inlined_call_operand.vmem [shape: f32[8,2,32], index: 2, kind: output, shape index: {0}]   ;;  %s1054_s3 = inlined_call_operand.hbm [shape: f32[2,32], index: 3, kind: output, shape index: {1}]   ;;  %s1055_s4 = inlined_call_operand.hbm [shape: f32[2,32], index: 4, kind: output, shape index: {2}]  }
   0x1   :  { %v26_v0 = vld [vmem:[%s1052_s1 + $0x18] sm:$0xff]  ;;  %v25_v1 = vld [vmem:[%s1052_s1 + $0x10] sm:$0xff]  ;;  %21 = vst.msk [vmem:[#allocation2] sm:$0x3] %vm20_vm0, %v870_v2  ;;  %v24_v3 = vld [vmem:[%s1052_s1 + $0x8] sm:$0xff] }
   0x2   :  { %45 = vmatpush.msra.mxu0 %v26_v0  ;;  %126 = vmatpush.msra.mxu1 %v26_v0  ;;  %22 = vst.msk [vmem:[#allocation3] sm:$0x3] %vm20_vm0, %v870_v2 }
   0x3   :  { %207 = vmatpush.msra.mxu2 %v26_v0  ;;  %288 = vmatpush.msra.mxu3 %v26_v0 }
   0x4   :  { %11 = vsyncpa [#allocation7], 0  ;;  %46 = vmatpush.msra.mxu0 %v25_v1  ;;  %127 = vmatpush.msra.mxu1 %v25_v1  ;;  %v23_v4 = vld [vmem:[%s1052_s1] sm:$0xff]  ;;  %vm29_vm1 = vcmask 261120   ;;  %s871_s24 = smov 64   ;;  %s872_s25 = smov 32  }
   0x5   :  { %208 = vmatpush.msra.mxu2 %v25_v1  ;;  %289 = vmatpush.msra.mxu3 %v25_v1  ;;  %v27_v6 = vld [vmem:[%s1051_s0] sm:$0x3]  ;;  %s873_s26 = smov 96   ;;  %v720_v37 = vld [vmem:[%s1051_s0 + $0x2] sm:$0x3]  ;;  %s702_s8 = sshll.u32 %s1055_s4, 4  ;;  %s703_s8 = int_to_ptr.hbm [resolvable:$true] %s702_s8 }
   0x6   :  { %47 = vmatpush.msra.mxu0 %v24_v3  ;;  %128 = vmatpush.msra.mxu1 %v24_v3  ;;  %s875_s9 = smov [#allocation4]   ;;  %s691_s4 = sshll.u32 %s1054_s3, 4  ;;  %s692_s4 = int_to_ptr.hbm [resolvable:$true] %s691_s4 }
   0x7   :  { %209 = vmatpush.msra.mxu2 %v24_v3  ;;  %290 = vmatpush.msra.mxu3 %v24_v3  ;;  %s689_s10 = sshll.u32 %s875_s9, 4  ;;  %s690_s10 = int_to_ptr.vmem [resolvable:$true] %s689_s10 }
   0x8   :  { %48 = vmatpush.msra.mxu0 %v23_v4  ;;  %129 = vmatpush.msra.mxu1 %v23_v4  ;;  %v28_v5 = vld [vmem:[#allocation2] sm:$0x3] }
   0x9   :  { %210 = vmatpush.msra.mxu2 %v23_v4  ;;  %291 = vmatpush.msra.mxu3 %v23_v4  ;;  %v74_v10 = vld [vmem:[#allocation3] sm:$0x3] }
   0xa   :  { %718 = vmatmul.msk.f32.vlgmr.msra.gmra.mxu0 %vm29_vm1, %v28_v5  ;;  %450 = vmatpush.msrb.mxu1 %v26_v0 }
   0xb   :  { %369 = vmatpush.msrb.mxu0 %v26_v0  ;;  %531 = vmatpush.msrb.mxu2 %v26_v0 }
   0xc   :  { %451 = vmatpush.msrb.mxu1 %v25_v1  ;;  %612 = vmatpush.msrb.mxu3 %v26_v0 }
   0xd   :  { %370 = vmatpush.msrb.mxu0 %v25_v1  ;;  %532 = vmatpush.msrb.mxu2 %v25_v1 }
   0xe   :  { %452 = vmatpush.msrb.mxu1 %v24_v3  ;;  %613 = vmatpush.msrb.mxu3 %v25_v1 }
   0xf   :  { %371 = vmatpush.msrb.mxu0 %v24_v3  ;;  %533 = vmatpush.msrb.mxu2 %v24_v3 }
  0x10   :  { %453 = vmatpush.msrb.mxu1 %v23_v4  ;;  %614 = vmatpush.msrb.mxu3 %v24_v3  ;;  %v724_v3 = vld [vmem:[%s1051_s0 + $0x4] sm:$0x3] }
  0x11   :  { %372 = vmatpush.msrb.mxu0 %v23_v4  ;;  %534 = vmatpush.msrb.mxu2 %v23_v4 }
  0x12   :  { %615 = vmatpush.msrb.mxu3 %v23_v4 }
  0x87   :  { %v50_v7 = vpop.f32.mrf.mxu0 }
  0x88   :  { %v53_v8 = vadd.f32 %v50_v7, %v27_v6 }
  0x8a   :  { %754 = vtanh.f32 %v53_v8  ;;  %v719_v11 = vmul.f32 -1.442695, %v53_v8 }
  0x8c   :  { %756 = vpow2.f32 %v719_v11 }
  0x90   :  { %v755_v9 = vpop.eup %754 }
  0x91   :  { %81 = vrot.lane.b32.xlu0 %v755_v9, %s871_s24 }
  0x92   :  { %v757_v12 = vpop.eup %756 }
  0x93   :  { %v58_v13 = vadd.f32 1.0, %v757_v12 }
  0x95   :  { %758 = vrcp.f32 %v58_v13  ;;  %v70_v19 = vand.u32 2147483648, %v58_v13  ;;  %vm64_vm3 = vweird.f32 %v58_v13  ;;  %v68_v20 = vand.u32 2147483647, %v58_v13 }
  0x97   :  { %v71_v22 = vor.u32 1.1754944e-38, %v70_v19  ;;  %vm69_vm5 = vcmp.eq.f32.partialorder %v68_v20, 8.507059e+37 }
  0x99   :  { %76 = vrot.lane.b32.xlu0 %v74_v10, %s872_s25 }
  0x9b   :  { %v759_v14 = vpop.eup %758 }
  0x9c   :  { %v60_v15 = vmul.f32 %v759_v14, %v58_v13  ;;  %vm65_vm2 = vweird.f32 %v759_v14 }
  0x9d   :  { %vm66_vm4 = vmor %vm64_vm3, %vm65_vm2 }
  0x9e   :  { %v61_v16 = vsub.f32 1.0, %v60_v15 }
  0xa0   :  { %v62_v17 = vmul.f32 %v759_v14, %v61_v16 }
  0xa2   :  { %v63_v18 = vadd.f32 %v759_v14, %v62_v17 }
  0xa4   :  { %v67_v21 = vsel %vm66_vm4, %v759_v14, %v63_v18 }
  0xa5   :  { %v72_v23 = vsel %vm69_vm5, %v71_v22, %v67_v21 }
 0x103   :  { %v82_v24 = vpop.permute.xlu0 %81 }
 0x104   :  { %v84_v25 = vmul.f32 %v82_v24, %v72_v23 }
 0x106   :  { %86 = vrot.lane.b32.xlu1 %v84_v25, %s873_s26 }
 0x10b   :  { %v77_v26 = vpop.permute.xlu0 %76 }
 0x10c   :  { %v79_v27 = vmul.f32 %v77_v26, %v72_v23 }
 0x178   :  { %v87_v28 = vpop.permute.xlu1 %86 }
 0x179   :  { %v89_v29 = vadd.f32 %v87_v28, %v79_v27 }
 0x17b   :  { %760 = vtanh.f32 %v89_v29 }
 0x181   :  { %v761_v30 = vpop.eup %760 }
 0x182   :  { %92 = vrot.lane.b32.xlu1 %v761_v30, %s871_s24 }
 0x1f4   :  { %v93_v31 = vpop.permute.xlu1 %92 }
 0x1f5   :  { %v95_v32 = vmul.f32 %v93_v31, %v72_v23 }
 0x1f7   :  { %97 = vrot.lane.b32.xlu2 %v95_v32, %s872_s25 }
 0x1ff   :  { %103 = vrot.lane.b32.xlu2 %v89_v29, %s873_s26 }
 0x251   :  { %v98_v33 = vpop.permute.xlu2 %97 }
 0x252   :  { %101 = vst.msk [vmem:[#allocation2] sm:$0x3] %vm20_vm0, %v98_v33 }
 0x253   :  { %107 = vst.msk [vmem:[%s1053_s2] sm:$0x3] %vm20_vm0, %v98_v33  ;;  %v728_v33 = vld [vmem:[%s1051_s0 + $0x6] sm:$0x3] }
 0x259   :  { %v104_v34 = vpop.permute.xlu2 %103  ;;  %v110_v35 = vld [vmem:[#allocation2] sm:$0x3] }
 0x25a   :  { %106 = vst.msk [vmem:[#allocation3] sm:$0x3] %vm20_vm0, %v104_v34  ;;  %721 = vmatmul.msk.f32.vlgmr.msra.gmra.mxu1 %vm29_vm1, %v110_v35 }
 0x261   :  { %v155_v36 = vld [vmem:[#allocation3] sm:$0x3] }
 0x262   :  { %157 = vrot.lane.b32.xlu1 %v155_v36, %s872_s25 }
 0x2d4   :  { %v158_v56 = vpop.permute.xlu1 %157 }
 0x2d7   :  { %v131_v38 = vpop.f32.mrf.mxu1 }
 0x2d8   :  { %v134_v39 = vadd.f32 %v720_v37, %v131_v38 }
 0x2da   :  { %762 = vtanh.f32 %v134_v39  ;;  %v722_v41 = vmul.f32 -1.442695, %v134_v39 }
 0x2dc   :  { %764 = vpow2.f32 %v722_v41 }
 0x2e0   :  { %v763_v40 = vpop.eup %762 }
 0x2e1   :  { %162 = vrot.lane.b32.xlu0 %v763_v40, %s871_s24 }
 0x2e2   :  { %v765_v42 = vpop.eup %764 }
 0x2e3   :  { %v139_v43 = vadd.f32 1.0, %v765_v42 }
 0x2e5   :  { %766 = vrcp.f32 %v139_v43  ;;  %v151_v49 = vand.u32 2147483648, %v139_v43  ;;  %vm145_vm7 = vweird.f32 %v139_v43  ;;  %v149_v50 = vand.u32 2147483647, %v139_v43 }
 0x2e7   :  { %v152_v52 = vor.u32 1.1754944e-38, %v151_v49  ;;  %vm150_vm9 = vcmp.eq.f32.partialorder %v149_v50, 8.507059e+37 }
 0x2eb   :  { %v767_v44 = vpop.eup %766 }
 0x2ec   :  { %v141_v45 = vmul.f32 %v767_v44, %v139_v43  ;;  %vm146_vm6 = vweird.f32 %v767_v44 }
 0x2ed   :  { %vm147_vm8 = vmor %vm145_vm7, %vm146_vm6 }
 0x2ee   :  { %v142_v46 = vsub.f32 1.0, %v141_v45 }
 0x2f0   :  { %v143_v47 = vmul.f32 %v767_v44, %v142_v46 }
 0x2f2   :  { %v144_v48 = vadd.f32 %v767_v44, %v143_v47 }
 0x2f4   :  { %v148_v51 = vsel %vm147_vm8, %v767_v44, %v144_v48 }
 0x2f5   :  { %v153_v53 = vsel %vm150_vm9, %v152_v52, %v148_v51 }
 0x2f6   :  { %v160_v57 = vmul.f32 %v158_v56, %v153_v53 }
 0x353   :  { %v163_v54 = vpop.permute.xlu0 %162 }
 0x354   :  { %v165_v55 = vmul.f32 %v163_v54, %v153_v53 }
 0x356   :  { %167 = vrot.lane.b32.xlu2 %v165_v55, %s873_s26 }
 0x3b0   :  { %v168_v58 = vpop.permute.xlu2 %167 }
 0x3b1   :  { %v170_v59 = vadd.f32 %v168_v58, %v160_v57 }
 0x3b3   :  { %768 = vtanh.f32 %v170_v59  ;;  %183 = vrot.lane.b32.xlu2 %v170_v59, %s873_s26 }
 0x3b9   :  { %v769_v60 = vpop.eup %768 }
 0x3ba   :  { %173 = vrot.lane.b32.xlu0 %v769_v60, %s871_s24 }
 0x40d   :  { %v184_v61 = vpop.permute.xlu2 %183 }
 0x40e   :  { %186 = vst.msk [vmem:[#allocation3] sm:$0x3] %vm20_vm0, %v184_v61 }
 0x415   :  { %v236_v0 = vld [vmem:[#allocation3] sm:$0x3] }
 0x42c   :  { %v174_v62 = vpop.permute.xlu0 %173 }
 0x42d   :  { %v176_v63 = vmul.f32 %v174_v62, %v153_v53 }
 0x42f   :  { %178 = vrot.lane.b32.xlu1 %v176_v63, %s872_s25  ;;  %v732_v63 = vld [vmem:[%s1051_s0 + $0x8] sm:$0x3] }
 0x437   :  { %238 = vrot.lane.b32.xlu1 %v236_v0, %s872_s25 }
 0x4a1   :  { %v179_v1 = vpop.permute.xlu1 %178 }
 0x4a2   :  { %181 = vst.msk [vmem:[#allocation2] sm:$0x3] %vm20_vm0, %v179_v1 }
 0x4a3   :  { %723 = vst.msk [vmem:[%s1053_s2 + $0x2] sm:$0x3] %vm20_vm0, %v179_v1 }
 0x4a9   :  { %v191_v2 = vld [vmem:[#allocation2] sm:$0x3]  ;;  %v239_v22 = vpop.permute.xlu1 %238 }
 0x4aa   :  { %725 = vmatmul.msk.f32.vlgmr.msra.gmra.mxu2 %vm29_vm1, %v191_v2 }
 0x52d   :  { %v212_v4 = vpop.f32.mrf.mxu2 }
 0x52e   :  { %v215_v5 = vadd.f32 %v724_v3, %v212_v4 }
 0x530   :  { %770 = vtanh.f32 %v215_v5  ;;  %v726_v7 = vmul.f32 -1.442695, %v215_v5 }
 0x532   :  { %772 = vpow2.f32 %v726_v7 }
 0x536   :  { %v771_v6 = vpop.eup %770 }
 0x537   :  { %243 = vrot.lane.b32.xlu0 %v771_v6, %s871_s24 }
 0x538   :  { %v773_v8 = vpop.eup %772 }
 0x539   :  { %v220_v9 = vadd.f32 1.0, %v773_v8 }
 0x53b   :  { %774 = vrcp.f32 %v220_v9  ;;  %v232_v15 = vand.u32 2147483648, %v220_v9  ;;  %vm226_vm11 = vweird.f32 %v220_v9  ;;  %v230_v16 = vand.u32 2147483647, %v220_v9 }
 0x53d   :  { %v233_v18 = vor.u32 1.1754944e-38, %v232_v15  ;;  %vm231_vm13 = vcmp.eq.f32.partialorder %v230_v16, 8.507059e+37 }
 0x541   :  { %v775_v10 = vpop.eup %774 }
 0x542   :  { %v222_v11 = vmul.f32 %v775_v10, %v220_v9  ;;  %vm227_vm10 = vweird.f32 %v775_v10 }
 0x543   :  { %vm228_vm12 = vmor %vm226_vm11, %vm227_vm10 }
 0x544   :  { %v223_v12 = vsub.f32 1.0, %v222_v11 }
 0x546   :  { %v224_v13 = vmul.f32 %v775_v10, %v223_v12 }
 0x548   :  { %v225_v14 = vadd.f32 %v775_v10, %v224_v13 }
 0x54a   :  { %v229_v17 = vsel %vm228_vm12, %v775_v10, %v225_v14 }
 0x54b   :  { %v234_v19 = vsel %vm231_vm13, %v233_v18, %v229_v17 }
 0x54c   :  { %v241_v23 = vmul.f32 %v239_v22, %v234_v19 }
 0x5a9   :  { %v244_v20 = vpop.permute.xlu0 %243 }
 0x5aa   :  { %v246_v21 = vmul.f32 %v244_v20, %v234_v19 }
 0x5ac   :  { %248 = vrot.lane.b32.xlu2 %v246_v21, %s873_s26 }
 0x606   :  { %v249_v24 = vpop.permute.xlu2 %248 }
 0x607   :  { %v251_v25 = vadd.f32 %v249_v24, %v241_v23 }
 0x609   :  { %776 = vtanh.f32 %v251_v25  ;;  %264 = vrot.lane.b32.xlu2 %v251_v25, %s873_s26 }
 0x60f   :  { %v777_v26 = vpop.eup %776 }
 0x610   :  { %254 = vrot.lane.b32.xlu0 %v777_v26, %s871_s24 }
 0x663   :  { %v265_v27 = vpop.permute.xlu2 %264 }
 0x664   :  { %267 = vst.msk [vmem:[#allocation3] sm:$0x3] %vm20_vm0, %v265_v27 }
 0x66b   :  { %v317_v30 = vld [vmem:[#allocation3] sm:$0x3] }
 0x682   :  { %v255_v28 = vpop.permute.xlu0 %254 }
 0x683   :  { %v257_v29 = vmul.f32 %v255_v28, %v234_v19 }
 0x685   :  { %259 = vrot.lane.b32.xlu1 %v257_v29, %s872_s25  ;;  %v736_v29 = vld [vmem:[%s1051_s0 + $0xa] sm:$0x3] }
 0x68d   :  { %319 = vrot.lane.b32.xlu1 %v317_v30, %s872_s25 }
 0x6f7   :  { %v260_v31 = vpop.permute.xlu1 %259 }
 0x6f8   :  { %262 = vst.msk [vmem:[#allocation2] sm:$0x3] %vm20_vm0, %v260_v31 }
 0x6f9   :  { %727 = vst.msk [vmem:[%s1053_s2 + $0x4] sm:$0x3] %vm20_vm0, %v260_v31 }
 0x6ff   :  { %v272_v32 = vld [vmem:[#allocation2] sm:$0x3]  ;;  %v320_v52 = vpop.permute.xlu1 %319 }
 0x700   :  { %729 = vmatmul.msk.f32.vlgmr.msra.gmra.mxu3 %vm29_vm1, %v272_v32 }
 0x783   :  { %v293_v34 = vpop.f32.mrf.mxu3 }
 0x784   :  { %v296_v35 = vadd.f32 %v728_v33, %v293_v34 }
 0x786   :  { %778 = vtanh.f32 %v296_v35  ;;  %v730_v37 = vmul.f32 -1.442695, %v296_v35 }
 0x788   :  { %780 = vpow2.f32 %v730_v37 }
 0x78c   :  { %v779_v36 = vpop.eup %778 }
 0x78d   :  { %324 = vrot.lane.b32.xlu0 %v779_v36, %s871_s24 }
 0x78e   :  { %v781_v38 = vpop.eup %780 }
 0x78f   :  { %v301_v39 = vadd.f32 1.0, %v781_v38 }
 0x791   :  { %782 = vrcp.f32 %v301_v39  ;;  %v313_v45 = vand.u32 2147483648, %v301_v39  ;;  %vm307_vm15 = vweird.f32 %v301_v39  ;;  %v311_v46 = vand.u32 2147483647, %v301_v39 }
 0x793   :  { %v314_v48 = vor.u32 1.1754944e-38, %v313_v45  ;;  %vm312_vm3 = vcmp.eq.f32.partialorder %v311_v46, 8.507059e+37 }
 0x797   :  { %v783_v40 = vpop.eup %782 }
 0x798   :  { %v303_v41 = vmul.f32 %v783_v40, %v301_v39  ;;  %vm308_vm14 = vweird.f32 %v783_v40 }
 0x799   :  { %vm309_vm2 = vmor %vm307_vm15, %vm308_vm14 }
 0x79a   :  { %v304_v42 = vsub.f32 1.0, %v303_v41 }
 0x79c   :  { %v305_v43 = vmul.f32 %v783_v40, %v304_v42 }
 0x79e   :  { %v306_v44 = vadd.f32 %v783_v40, %v305_v43 }
 0x7a0   :  { %v310_v47 = vsel %vm309_vm2, %v783_v40, %v306_v44 }
 0x7a1   :  { %v315_v49 = vsel %vm312_vm3, %v314_v48, %v310_v47 }
 0x7a2   :  { %v322_v53 = vmul.f32 %v320_v52, %v315_v49 }
 0x7ff   :  { %v325_v50 = vpop.permute.xlu0 %324 }
 0x800   :  { %v327_v51 = vmul.f32 %v325_v50, %v315_v49 }
 0x802   :  { %329 = vrot.lane.b32.xlu2 %v327_v51, %s873_s26 }
 0x85c   :  { %v330_v54 = vpop.permute.xlu2 %329 }
 0x85d   :  { %v332_v55 = vadd.f32 %v330_v54, %v322_v53 }
 0x85f   :  { %784 = vtanh.f32 %v332_v55  ;;  %345 = vrot.lane.b32.xlu2 %v332_v55, %s873_s26 }
 0x865   :  { %v785_v56 = vpop.eup %784 }
 0x866   :  { %335 = vrot.lane.b32.xlu0 %v785_v56, %s871_s24 }
 0x8b9   :  { %v346_v57 = vpop.permute.xlu2 %345 }
 0x8ba   :  { %348 = vst.msk [vmem:[#allocation3] sm:$0x3] %vm20_vm0, %v346_v57 }
 0x8c1   :  { %v398_v60 = vld [vmem:[#allocation3] sm:$0x3] }
 0x8d8   :  { %v336_v58 = vpop.permute.xlu0 %335 }
 0x8d9   :  { %v338_v59 = vmul.f32 %v336_v58, %v315_v49 }
 0x8db   :  { %340 = vrot.lane.b32.xlu1 %v338_v59, %s872_s25  ;;  %v740_v59 = vld [vmem:[%s1051_s0 + $0xc] sm:$0x3] }
 0x8e3   :  { %400 = vrot.lane.b32.xlu1 %v398_v60, %s872_s25 }
 0x94d   :  { %v341_v61 = vpop.permute.xlu1 %340 }
 0x94e   :  { %343 = vst.msk [vmem:[#allocation2] sm:$0x3] %vm20_vm0, %v341_v61 }
 0x94f   :  { %731 = vst.msk [vmem:[%s1053_s2 + $0x6] sm:$0x3] %vm20_vm0, %v341_v61 }
 0x955   :  { %v353_v62 = vld [vmem:[#allocation2] sm:$0x3]  ;;  %v401_v18 = vpop.permute.xlu1 %400 }
 0x956   :  { %733 = vmatmul.msk.f32.vlgmr.msrb.gmra.mxu0 %vm29_vm1, %v353_v62 }
 0x9d3   :  { %v374_v0 = vpop.f32.mrf.mxu0 }
 0x9d4   :  { %v377_v1 = vadd.f32 %v732_v63, %v374_v0 }
 0x9d6   :  { %786 = vtanh.f32 %v377_v1  ;;  %v734_v3 = vmul.f32 -1.442695, %v377_v1 }
 0x9d8   :  { %788 = vpow2.f32 %v734_v3 }
 0x9dc   :  { %v787_v2 = vpop.eup %786 }
 0x9dd   :  { %405 = vrot.lane.b32.xlu0 %v787_v2, %s871_s24 }
 0x9de   :  { %v789_v4 = vpop.eup %788 }
 0x9df   :  { %v382_v5 = vadd.f32 1.0, %v789_v4 }
 0x9e1   :  { %790 = vrcp.f32 %v382_v5  ;;  %v394_v11 = vand.u32 2147483648, %v382_v5  ;;  %vm388_vm5 = vweird.f32 %v382_v5  ;;  %v392_v12 = vand.u32 2147483647, %v382_v5 }
 0x9e3   :  { %v395_v14 = vor.u32 1.1754944e-38, %v394_v11  ;;  %vm393_vm7 = vcmp.eq.f32.partialorder %v392_v12, 8.507059e+37 }
 0x9e7   :  { %v791_v6 = vpop.eup %790 }
 0x9e8   :  { %v384_v7 = vmul.f32 %v791_v6, %v382_v5  ;;  %vm389_vm4 = vweird.f32 %v791_v6 }
 0x9e9   :  { %vm390_vm6 = vmor %vm388_vm5, %vm389_vm4 }
 0x9ea   :  { %v385_v8 = vsub.f32 1.0, %v384_v7 }
 0x9ec   :  { %v386_v9 = vmul.f32 %v791_v6, %v385_v8 }
 0x9ee   :  { %v387_v10 = vadd.f32 %v791_v6, %v386_v9 }
 0x9f0   :  { %v391_v13 = vsel %vm390_vm6, %v791_v6, %v387_v10 }
 0x9f1   :  { %v396_v15 = vsel %vm393_vm7, %v395_v14, %v391_v13 }
 0x9f2   :  { %v403_v19 = vmul.f32 %v401_v18, %v396_v15 }
 0xa4f   :  { %v406_v16 = vpop.permute.xlu0 %405 }
 0xa50   :  { %v408_v17 = vmul.f32 %v406_v16, %v396_v15 }
 0xa52   :  { %410 = vrot.lane.b32.xlu2 %v408_v17, %s873_s26 }
 0xaac   :  { %v411_v20 = vpop.permute.xlu2 %410 }
 0xaad   :  { %v413_v21 = vadd.f32 %v411_v20, %v403_v19 }
 0xaaf   :  { %792 = vtanh.f32 %v413_v21  ;;  %426 = vrot.lane.b32.xlu2 %v413_v21, %s873_s26 }
 0xab5   :  { %v793_v22 = vpop.eup %792 }
 0xab6   :  { %416 = vrot.lane.b32.xlu0 %v793_v22, %s871_s24 }
 0xb09   :  { %v427_v23 = vpop.permute.xlu2 %426 }
 0xb0a   :  { %429 = vst.msk [vmem:[#allocation3] sm:$0x3] %vm20_vm0, %v427_v23 }
 0xb11   :  { %v479_v26 = vld [vmem:[#allocation3] sm:$0x3] }
 0xb28   :  { %v417_v24 = vpop.permute.xlu0 %416 }
 0xb29   :  { %v419_v25 = vmul.f32 %v417_v24, %v396_v15 }
 0xb2b   :  { %421 = vrot.lane.b32.xlu1 %v419_v25, %s872_s25  ;;  %v744_v25 = vld [vmem:[%s1051_s0 + $0xe] sm:$0x3]  ;;  %s874_s0 = smov [#allocation6]  }
 0xb2c   :  { %s700_s5 = sshll.u32 %s874_s0, 4  ;;  %s701_s5 = int_to_ptr.vmem [resolvable:$true] %s700_s5 }
 0xb33   :  { %481 = vrot.lane.b32.xlu1 %v479_v26, %s872_s25 }
 0xb9d   :  { %v422_v27 = vpop.permute.xlu1 %421 }
 0xb9e   :  { %424 = vst.msk [vmem:[#allocation2] sm:$0x3] %vm20_vm0, %v422_v27 }
 0xb9f   :  { %735 = vst.msk [vmem:[%s1053_s2 + $0x8] sm:$0x3] %vm20_vm0, %v422_v27 }
 0xba5   :  { %v434_v28 = vld [vmem:[#allocation2] sm:$0x3]  ;;  %v482_v48 = vpop.permute.xlu1 %481 }
 0xba6   :  { %737 = vmatmul.msk.f32.vlgmr.msrb.gmra.mxu1 %vm29_vm1, %v434_v28 }
 0xc23   :  { %v455_v30 = vpop.f32.mrf.mxu1 }
 0xc24   :  { %v458_v31 = vadd.f32 %v736_v29, %v455_v30 }
 0xc26   :  { %794 = vtanh.f32 %v458_v31  ;;  %v738_v33 = vmul.f32 -1.442695, %v458_v31 }
 0xc28   :  { %796 = vpow2.f32 %v738_v33 }
 0xc2c   :  { %v795_v32 = vpop.eup %794 }
 0xc2d   :  { %486 = vrot.lane.b32.xlu0 %v795_v32, %s871_s24 }
 0xc2e   :  { %v797_v34 = vpop.eup %796 }
 0xc2f   :  { %v463_v35 = vadd.f32 1.0, %v797_v34 }
 0xc31   :  { %798 = vrcp.f32 %v463_v35  ;;  %v475_v41 = vand.u32 2147483648, %v463_v35  ;;  %vm469_vm9 = vweird.f32 %v463_v35  ;;  %v473_v42 = vand.u32 2147483647, %v463_v35 }
 0xc33   :  { %v476_v44 = vor.u32 1.1754944e-38, %v475_v41  ;;  %vm474_vm11 = vcmp.eq.f32.partialorder %v473_v42, 8.507059e+37 }
 0xc37   :  { %v799_v36 = vpop.eup %798 }
 0xc38   :  { %v465_v37 = vmul.f32 %v799_v36, %v463_v35  ;;  %vm470_vm8 = vweird.f32 %v799_v36 }
 0xc39   :  { %vm471_vm10 = vmor %vm469_vm9, %vm470_vm8 }
 0xc3a   :  { %v466_v38 = vsub.f32 1.0, %v465_v37 }
 0xc3c   :  { %v467_v39 = vmul.f32 %v799_v36, %v466_v38 }
 0xc3e   :  { %v468_v40 = vadd.f32 %v799_v36, %v467_v39 }
 0xc40   :  { %v472_v43 = vsel %vm471_vm10, %v799_v36, %v468_v40 }
 0xc41   :  { %v477_v45 = vsel %vm474_vm11, %v476_v44, %v472_v43 }
 0xc42   :  { %v484_v49 = vmul.f32 %v482_v48, %v477_v45 }
 0xc9f   :  { %v487_v46 = vpop.permute.xlu0 %486 }
 0xca0   :  { %v489_v47 = vmul.f32 %v487_v46, %v477_v45 }
 0xca2   :  { %491 = vrot.lane.b32.xlu2 %v489_v47, %s873_s26 }
 0xcfc   :  { %v492_v50 = vpop.permute.xlu2 %491 }
 0xcfd   :  { %v494_v51 = vadd.f32 %v492_v50, %v484_v49 }
 0xcff   :  { %800 = vtanh.f32 %v494_v51  ;;  %507 = vrot.lane.b32.xlu2 %v494_v51, %s873_s26 }
 0xd05   :  { %v801_v52 = vpop.eup %800 }
 0xd06   :  { %497 = vrot.lane.b32.xlu0 %v801_v52, %s871_s24 }
 0xd59   :  { %v508_v53 = vpop.permute.xlu2 %507 }
 0xd5a   :  { %510 = vst.msk [vmem:[#allocation3] sm:$0x3] %vm20_vm0, %v508_v53 }
 0xd61   :  { %v560_v56 = vld [vmem:[#allocation3] sm:$0x3] }
 0xd78   :  { %v498_v54 = vpop.permute.xlu0 %497 }
 0xd79   :  { %v500_v55 = vmul.f32 %v498_v54, %v477_v45 }
 0xd7b   :  { %502 = vrot.lane.b32.xlu1 %v500_v55, %s872_s25 }
 0xd83   :  { %562 = vrot.lane.b32.xlu1 %v560_v56, %s872_s25 }
 0xded   :  { %v503_v57 = vpop.permute.xlu1 %502 }
 0xdee   :  { %505 = vst.msk [vmem:[#allocation2] sm:$0x3] %vm20_vm0, %v503_v57 }
 0xdef   :  { %739 = vst.msk [vmem:[%s1053_s2 + $0xa] sm:$0x3] %vm20_vm0, %v503_v57 }
 0xdf5   :  { %v515_v58 = vld [vmem:[#allocation2] sm:$0x3]  ;;  %v563_v14 = vpop.permute.xlu1 %562 }
 0xdf6   :  { %741 = vmatmul.msk.f32.vlgmr.msrb.gmra.mxu2 %vm29_vm1, %v515_v58 }
 0xe79   :  { %v536_v60 = vpop.f32.mrf.mxu2 }
 0xe7a   :  { %v539_v61 = vadd.f32 %v740_v59, %v536_v60 }
 0xe7c   :  { %802 = vtanh.f32 %v539_v61  ;;  %v742_v63 = vmul.f32 -1.442695, %v539_v61 }
 0xe7e   :  { %804 = vpow2.f32 %v742_v63 }
 0xe82   :  { %v803_v62 = vpop.eup %802 }
 0xe83   :  { %567 = vrot.lane.b32.xlu0 %v803_v62, %s871_s24 }
 0xe84   :  { %v805_v0 = vpop.eup %804 }
 0xe85   :  { %v544_v1 = vadd.f32 1.0, %v805_v0 }
 0xe87   :  { %806 = vrcp.f32 %v544_v1  ;;  %v556_v7 = vand.u32 2147483648, %v544_v1  ;;  %vm550_vm13 = vweird.f32 %v544_v1  ;;  %v554_v8 = vand.u32 2147483647, %v544_v1 }
 0xe89   :  { %v557_v10 = vor.u32 1.1754944e-38, %v556_v7  ;;  %vm555_vm15 = vcmp.eq.f32.partialorder %v554_v8, 8.507059e+37 }
 0xe8d   :  { %v807_v2 = vpop.eup %806 }
 0xe8e   :  { %v546_v3 = vmul.f32 %v807_v2, %v544_v1  ;;  %vm551_vm12 = vweird.f32 %v807_v2 }
 0xe8f   :  { %vm552_vm14 = vmor %vm550_vm13, %vm551_vm12 }
 0xe90   :  { %v547_v4 = vsub.f32 1.0, %v546_v3 }
 0xe92   :  { %v548_v5 = vmul.f32 %v807_v2, %v547_v4 }
 0xe94   :  { %v549_v6 = vadd.f32 %v807_v2, %v548_v5 }
 0xe96   :  { %v553_v9 = vsel %vm552_vm14, %v807_v2, %v549_v6 }
 0xe97   :  { %v558_v11 = vsel %vm555_vm15, %v557_v10, %v553_v9 }
 0xe98   :  { %v565_v15 = vmul.f32 %v563_v14, %v558_v11 }
 0xef5   :  { %v568_v12 = vpop.permute.xlu0 %567 }
 0xef6   :  { %v570_v13 = vmul.f32 %v568_v12, %v558_v11 }
 0xef8   :  { %572 = vrot.lane.b32.xlu2 %v570_v13, %s873_s26 }
 0xf52   :  { %v573_v16 = vpop.permute.xlu2 %572 }
 0xf53   :  { %v575_v17 = vadd.f32 %v573_v16, %v565_v15 }
 0xf55   :  { %808 = vtanh.f32 %v575_v17  ;;  %588 = vrot.lane.b32.xlu2 %v575_v17, %s873_s26 }
 0xf5b   :  { %v809_v18 = vpop.eup %808 }
 0xf5c   :  { %578 = vrot.lane.b32.xlu0 %v809_v18, %s871_s24 }
 0xfaf   :  { %v589_v19 = vpop.permute.xlu2 %588 }
 0xfb0   :  { %591 = vst.msk [vmem:[#allocation3] sm:$0x3] %vm20_vm0, %v589_v19 }
 0xfb7   :  { %v641_v22 = vld [vmem:[#allocation3] sm:$0x3] }
 0xfce   :  { %v579_v20 = vpop.permute.xlu0 %578 }
 0xfcf   :  { %v581_v21 = vmul.f32 %v579_v20, %v558_v11 }
 0xfd1   :  { %583 = vrot.lane.b32.xlu1 %v581_v21, %s872_s25 }
 0xfd9   :  { %643 = vrot.lane.b32.xlu1 %v641_v22, %s872_s25 }
0x1043   :  { %v584_v23 = vpop.permute.xlu1 %583 }
0x1044   :  { %586 = vst.msk [vmem:[#allocation2] sm:$0x3] %vm20_vm0, %v584_v23 }
0x1045   :  { %743 = vst.msk [vmem:[%s1053_s2 + $0xc] sm:$0x3] %vm20_vm0, %v584_v23 }
0x104b   :  { %v596_v24 = vld [vmem:[#allocation2] sm:$0x3]  ;;  %v644_v44 = vpop.permute.xlu1 %643 }
0x104c   :  { %745 = vmatmul.msk.f32.vlgmr.msrb.gmra.mxu3 %vm29_vm1, %v596_v24 }
0x10cf   :  { %v617_v26 = vpop.f32.mrf.mxu3 }
0x10d0   :  { %v620_v27 = vadd.f32 %v744_v25, %v617_v26 }
0x10d2   :  { %810 = vtanh.f32 %v620_v27  ;;  %v746_v29 = vmul.f32 -1.442695, %v620_v27 }
0x10d4   :  { %812 = vpow2.f32 %v746_v29 }
0x10d8   :  { %v811_v28 = vpop.eup %810 }
0x10d9   :  { %648 = vrot.lane.b32.xlu0 %v811_v28, %s871_s24 }
0x10da   :  { %v813_v30 = vpop.eup %812 }
0x10db   :  { %v625_v31 = vadd.f32 1.0, %v813_v30 }
0x10dd   :  { %814 = vrcp.f32 %v625_v31  ;;  %v637_v37 = vand.u32 2147483648, %v625_v31  ;;  %vm631_vm2 = vweird.f32 %v625_v31  ;;  %v635_v38 = vand.u32 2147483647, %v625_v31 }
0x10df   :  { %v638_v40 = vor.u32 1.1754944e-38, %v637_v37  ;;  %vm636_vm4 = vcmp.eq.f32.partialorder %v635_v38, 8.507059e+37 }
0x10e3   :  { %v815_v32 = vpop.eup %814 }
0x10e4   :  { %v627_v33 = vmul.f32 %v815_v32, %v625_v31  ;;  %vm632_vm1 = vweird.f32 %v815_v32 }
0x10e5   :  { %vm633_vm3 = vmor %vm631_vm2, %vm632_vm1 }
0x10e6   :  { %v628_v34 = vsub.f32 1.0, %v627_v33 }
0x10e8   :  { %v629_v35 = vmul.f32 %v815_v32, %v628_v34 }
0x10ea   :  { %v630_v36 = vadd.f32 %v815_v32, %v629_v35 }
0x10ec   :  { %v634_v39 = vsel %vm633_vm3, %v815_v32, %v630_v36 }
0x10ed   :  { %v639_v41 = vsel %vm636_vm4, %v638_v40, %v634_v39 }
0x10ee   :  { %v646_v45 = vmul.f32 %v644_v44, %v639_v41 }
0x114b   :  { %v649_v42 = vpop.permute.xlu0 %648 }
0x114c   :  { %v651_v43 = vmul.f32 %v649_v42, %v639_v41 }
0x114e   :  { %653 = vrot.lane.b32.xlu2 %v651_v43, %s873_s26 }
0x11a8   :  { %v654_v46 = vpop.permute.xlu2 %653 }
0x11a9   :  { %v656_v47 = vadd.f32 %v654_v46, %v646_v45 }
0x11ab   :  { %816 = vtanh.f32 %v656_v47  ;;  %669 = vrot.lane.b32.xlu2 %v656_v47, %s873_s26 }
0x11b1   :  { %v817_v48 = vpop.eup %816 }
0x11b2   :  { %659 = vrot.lane.b32.xlu0 %v817_v48, %s871_s24 }
0x1205   :  { %v670_v49 = vpop.permute.xlu2 %669 }
0x1206   :  { %672 = vst.msk [vmem:[#allocation3] sm:$0x3] %vm20_vm0, %v670_v49 }
0x120d   :  { %v680_v50 = vld [vmem:[#allocation3] sm:$0x3] }
0x120e   :  { %681 = vst.msk [vmem:[#allocation6] sm:$0x3] %vm20_vm0, %v680_v50 }
0x120f   :  { %705 = dma.vmem_to_hbm [thread:$0]  %s701_s5, 32, %s703_s8, [#allocation7]  }
0x1224   :  { %v660_v51 = vpop.permute.xlu0 %659 }
0x1225   :  { %v662_v52 = vmul.f32 %v660_v51, %v639_v41 }
0x1227   :  { %664 = vrot.lane.b32.xlu1 %v662_v52, %s872_s25 }
0x1299   :  { %v665_v53 = vpop.permute.xlu1 %664 }
0x129a   :  { %667 = vst.msk [vmem:[#allocation2] sm:$0x3] %vm20_vm0, %v665_v53 }
0x129b   :  { %747 = vst.msk [vmem:[%s1053_s2 + $0xe] sm:$0x3] %vm20_vm0, %v665_v53 }
0x12a1   :  { %v678_v54 = vld [vmem:[#allocation2] sm:$0x3] }
0x12a2   :  { %679 = vst.msk [vmem:[#allocation4] sm:$0x3] %vm20_vm0, %v678_v54 }
0x12a3   :  { %694 = dma.vmem_to_hbm [thread:$0]  %s690_s10, 32, %s692_s4, [#allocation5]  }
0x12a4   :  { %866 = dma.done.wait [#allocation5], 32  }
0x12a5   :  { %867 = vsyncadd [#allocation5], 4294967264 }
0x12a6   :  { %868 = dma.done.wait [#allocation7], 32  }
0x12a7   :  { %869 = vsyncadd [#allocation7], 4294967264 }
0x12a8   :  { %716 = vsyncpa [#allocation5], 1 }
0x12a9   :  { %717 = vsyncpa [#allocation7], 1 }

</bundles_post_ra>
